<compile_context>
chip_gen: v5e
topology: v5e:2x2
jax: 0.10.0
libtpu: 0.0.40
codegen_flags: <defaults>
</compile_context>

<pallas_src>
import functools
import math

import jax
import jax.numpy as jnp
from jax.experimental import pallas as pl
from jax.experimental.pallas import tpu as pltpu


_ACC_BYTES_CAP = 4 * 1024 * 1024      # live f32 accumulator per grid step


def _round_up(x, m):
    return (x + m - 1) // m * m


def _vmem_budget_bytes():
    """Generation-aware VMEM budget (leaves headroom for compiler scratch)."""
    phys = 64 * 1024 * 1024                      # conservative default (v7x)
    try:
        info = pltpu.get_tpu_info()
        phys = int(getattr(info, "vmem_capacity_bytes", phys))
    except Exception:
        pass
    # ~52 MiB on v7x (64 MiB phys), ~102 MiB on v5e/v6e (128 MiB phys).
    return max(16 * 1024 * 1024, min(int(phys * 0.8), phys - 12 * 1024 * 1024))


def _valid_tile_hs(H, W):
    """Divisors of H (descending) giving a legal lane/sublane output block."""
    out = []
    for d in range(H, 0, -1):
        if H % d:
            continue
        if (d * W) % 8 == 0 or d == H:
            out.append(d)
    return out


def _step_bytes(th, *, resident, H, W, Cin, Cp, in_item, out_item):
    """Per-grid-step VMEM footprint estimate (includes weights + temps)."""
    Hp, Wp = H + 2, W + 2
    M = th * W
    w_b = 2 * (9 * Cin * Cp * in_item + Cp * 4)        # dbl-buffered W + shift
    out_b = 2 * M * Cp * out_item                      # dbl-buffered out tile
    acc_b = M * Cp * 4                                 # f32 accumulator
    tmp_b = 2 * (th * Wp * Cin + M * Cin) * max(in_item, 4)   # slice/reshape temps
    if resident:
        in_b = 2 * Hp * Wp * Cin * in_item             # dbl-buffered whole image
    else:
        in_b = (th + 2) * Wp * Cin * in_item           # single manual-DMA scratch
    return w_b + out_b + acc_b + tmp_b + in_b


def _plan(N, H, W, Cin, Cp, in_item, out_item, budget, force_manual):
    """Pick (mode, tile_h).  mode: 'resident' (whole padded image in VMEM,
    auto-pipelined) or 'manual' (pl.ANY input + per-step sync DMA window)."""
    cands = _valid_tile_hs(H, W)

    def fits(th, resident):
        return (th * W * Cp * 4 <= _ACC_BYTES_CAP and
                _step_bytes(th, resident=resident, H=H, W=W, Cin=Cin, Cp=Cp,
                            in_item=in_item, out_item=out_item) <= budget)

    def prefer_parallel(th, ok):
        # Keep both v7x TensorCores busy: ensure >= 2 grid steps if possible.
        if N * (H // th) < 2:
            for t in ok:
                if H // t >= 2:
                    return t
        return th

    if not force_manual:
        ok = [t for t in cands if fits(t, True)]
        if ok:
            return "resident", prefer_parallel(ok[0], ok)
    ok = [t for t in cands if fits(t, False)]
    th = ok[0] if ok else cands[-1]
    return "manual", prefer_parallel(th, ok or cands)


# ----------------------------------------------------------------------------
# Kernels
# ----------------------------------------------------------------------------
def _conv_taps_accumulate(x_ref, row0, w_ref, shift_ref, o_ref):
    """3x3 conv over a VMEM (rows, W+2, Cin) slab; fused BN-shift + ReLU.

    x_ref     : (rows, W+2, Cin) padded NHWC slab (VMEM ref)
    row0      : starting padded row of this output tile inside x_ref
    w_ref     : (3, 3, Cin, Cp)  HWIO weights, BN scale folded, Cout->Cp pad
    shift_ref : (1, Cp)          BN shift (zeros when batch_norm=False), f32
    o_ref     : (TH*W, Cp)       lane-dense output slab
    """
    M, Cp = o_ref.shape
    Wp, Cin = x_ref.shape[-2], x_ref.shape[-1]
    W = Wp - 2
    TH = M // W

    acc = jnp.zeros((M, Cp), jnp.float32)
    # 9 taps = 9 MXU matmuls with K = Cin; slicing is a leading-axis base
    # offset (kh) plus a static sublane offset (kw).  Clean acc += dot chain
    # (f32 accumulate, MRB-friendly on v7x).
    for kh in range(3):
        rows = x_ref[pl.ds(row0 + kh, TH)]                 # (TH, W+2, Cin)
        for kw in range(3):
            patch = rows[:, kw:kw + W, :].reshape(M, Cin)  # layout-preserving
            acc = acc + jnp.dot(patch, w_ref[kh, kw],
                                preferred_element_type=jnp.float32)

    out = jnp.maximum(acc + shift_ref[0, :], 0.0)          # fused shift + ReLU
    o_ref[...] = out.astype(o_ref.dtype)                   # full-lane store


def _resident_kernel(x_ref, w_ref, shift_ref, o_ref):
    """Whole padded image resident in VMEM; H-tile = offset into the slab."""
    W = x_ref.shape[1] - 2
    TH = o_ref.shape[0] // W
    row0 = pl.program_id(1) * TH
    _conv_taps_accumulate(x_ref, row0, w_ref, shift_ref, o_ref)


def _manual_dma_kernel(x_hbm, w_ref, shift_ref, o_ref, xbuf):
    """Input stays in HBM; copy only the (TH+2) row window needed this step."""
    n = pl.program_id(0)
    h = pl.program_id(1)
    TH = xbuf.shape[0] - 2
    pltpu.sync_copy(x_hbm.at[n, pl.ds(h * TH, TH + 2)], xbuf)
    _conv_taps_accumulate(xbuf, 0, w_ref, shift_ref, o_ref)


# ----------------------------------------------------------------------------
# Wrapper
# ----------------------------------------------------------------------------
@functools.partial(
    jax.jit,
    static_argnames=("batch_norm", "tile_h", "compute_dtype", "out_dtype",
                     "data_format", "force_manual_dma"))
def block_forward(x, weight_oihw, bn_params=None, *, batch_norm=False,
                  tile_h=None, compute_dtype=jnp.bfloat16, out_dtype=None,
                  data_format="NCHW", force_manual_dma=False, eps=1e-5):
    """JAX/Pallas equivalent of BLOCK.forward.

    x           : (N, Cin, H, W) if data_format=="NCHW", else (N, H, W, Cin)
    weight_oihw : (Cout, Cin, 3, 3)  conv3x3, bias=False
    bn_params   : (gamma, beta, running_mean, running_var), each (Cout,)
    """
    if data_format == "NCHW":
        N, Cin, H, W = x.shape
        x_nhwc = jnp.transpose(x, (0, 2, 3, 1))
    elif data_format == "NHWC":
        N, H, W, Cin = x.shape
        x_nhwc = x
    else:
        raise ValueError("data_format must be 'NCHW' or 'NHWC'")

    Cout = weight_oihw.shape[0]
    Cp = _round_up(Cout, 128)                 # lane-dense output channel count
    out_dt = jnp.dtype(out_dtype) if out_dtype is not None else x.dtype

    # ---- BN (eval-mode) folding into the conv weights ----------------------
    # NOTE: bf16 weight quantization error scales with |gamma/sqrt(var+eps)|;
    # re-validate tolerance for very wide layers if scales are extreme.
    w_hwio = jnp.transpose(weight_oihw, (2, 3, 1, 0)).astype(jnp.float32)
    if batch_norm:
        gamma, beta, mean, var = bn_params
        scale = gamma / jnp.sqrt(var + eps)
        shift = beta - mean * scale
        w_hwio = w_hwio * scale               # conv(x, w*s) == conv(x, w)*s
    else:
        shift = jnp.zeros((Cout,), jnp.float32)
    w_p = jnp.pad(w_hwio, ((0, 0), (0, 0), (0, 0), (0, Cp - Cout))
                  ).astype(compute_dtype)                       # (3,3,Cin,Cp)
    shift_p = jnp.pad(shift.reshape(1, Cout).astype(jnp.float32),
                      ((0, 0), (0, Cp - Cout)))                 # (1, Cp)

    # ---- single 'same'-pad pass; input is NOT duplicated -------------------
    x_p = jnp.pad(x_nhwc.astype(compute_dtype),
                  ((0, 0), (1, 1), (1, 1), (0, 0)))             # (N,H+2,W+2,Cin)

    in_item = jnp.dtype(compute_dtype).itemsize
    out_item = jnp.dtype(out_dt).itemsize
    budget = _vmem_budget_bytes()
    mode, th_auto = _plan(N, H, W, Cin, Cp, in_item, out_item, budget,
                          force_manual_dma)
    TH = tile_h if tile_h is not None else th_auto
    assert H % TH == 0 and ((TH * W) % 8 == 0 or TH == H), "invalid tile_h"
    nH = H // TH
    Hp, Wp = H + 2, W + 2

    w_spec = pl.BlockSpec((3, 3, Cin, Cp), lambda n, h: (0, 0, 0, 0))
    s_spec = pl.BlockSpec((1, Cp), lambda n, h: (0, 0))
    out_spec = pl.BlockSpec((pl.Squeezed(), TH * W, Cp), lambda n, h: (n, h, 0))
    out_shape = jax.ShapeDtypeStruct((N, H * W, Cp), out_dt)
    cparams = pltpu.CompilerParams(
        dimension_semantics=("parallel", "parallel"),
        vmem_limit_bytes=budget)

    if mode == "resident":
        out_p = pl.pallas_call(
            _resident_kernel,
            out_shape=out_shape,
            grid=(N, nH),
            in_specs=[
                # Whole padded image per n: re-DMA'd only when n changes.
                pl.BlockSpec((pl.Squeezed(), Hp, Wp, Cin),
                             lambda n, h: (n, 0, 0, 0)),
                w_spec, s_spec,
            ],
            out_specs=out_spec,
            compiler_params=cparams,
        )(x_p, w_p, shift_p)
    else:
        out_p = pl.pallas_call(
            _manual_dma_kernel,
            out_shape=out_shape,
            grid=(N, nH),
            in_specs=[pl.BlockSpec(memory_space=pl.ANY), w_spec, s_spec],
            out_specs=out_spec,
            scratch_shapes=[pltpu.VMEM((TH + 2, Wp, Cin),
                                       jnp.dtype(compute_dtype))],
            compiler_params=cparams,
        )(x_p, w_p, shift_p)

    out = out_p[:, :, :Cout].reshape(N, H, W, Cout)   # pad slice: no-op when Cp==Cout
    if data_format == "NCHW":
        out = jnp.transpose(out, (0, 3, 1, 2))
    return out


# ----------------------------------------------------------------------------
# Pure-JAX reference
# ----------------------------------------------------------------------------
def _reference(x_nchw, weight_oihw, *, batch_norm=False, bn_params=None,
               eps=1e-5):
    out = jax.lax.conv_general_dilated(
        x_nchw, weight_oihw, window_strides=(1, 1), padding="SAME",
        dimension_numbers=("NCHW", "OIHW", "NCHW"))
    if batch_norm:
        gamma, beta, mean, var = bn_params
        out = (out - mean[None, :, None, None]) / jnp.sqrt(
            var[None, :, None, None] + eps)
        out = out * gamma[None, :, None, None] + beta[None, :, None, None]
    return jax.nn.relu(out)


if __name__ == "__main__":
    key = jax.random.PRNGKey(0)
    ks = jax.random.split(key, 10)

    # --- Case 1: default small shapes (N=2, Cin=4, Cout=8, 16x16) ----------
    N, Cin, Cout, H, W = 2, 4, 8, 16, 16
    x = jax.random.normal(ks[0], (N, Cin, H, W), jnp.float32)
    w = jax.random.normal(ks[1], (Cout, Cin, 3, 3), jnp.float32) * math.sqrt(
        2.0 / (Cin * 9))
    ref = _reference(x, w, batch_norm=False)

    # exact f32 compute path: conv3x3 -> ReLU
    out_f32 = block_forward(x, w, batch_norm=False, compute_dtype=jnp.float32)
    jax.block_until_ready(out_f32)
    assert out_f32.shape == (N, Cout, H, W)
    assert jnp.allclose(out_f32, ref, atol=1e-4, rtol=1e-4), "f32 conv+relu mismatch"

    # default bf16-compute path (f32 accumulate), loose tolerance
    out_bf = block_forward(x, w, batch_norm=False)
    jax.block_until_ready(out_bf)
    assert jnp.allclose(out_bf, ref, atol=5e-2, rtol=5e-2), "bf16 compute mismatch"

    # bf16 output for layer chaining
    out_bf_o = block_forward(x, w, batch_norm=False, out_dtype=jnp.bfloat16)
    jax.block_until_ready(out_bf_o)
    assert out_bf_o.dtype == jnp.bfloat16
    assert jnp.allclose(out_bf_o.astype(jnp.float32), ref, atol=5e-2,
                        rtol=5e-2), "bf16 output mismatch"

    # conv3x3 -> BN(eval, folded) -> ReLU
    gamma = 1.0 + 0.1 * jax.random.normal(ks[2], (Cout,), jnp.float32)
    beta = 0.1 * jax.random.normal(ks[3], (Cout,), jnp.float32)
    mean = 0.1 * jax.random.normal(ks[4], (Cout,), jnp.float32)
    var = 1.0 + 0.1 * jax.random.uniform(ks[5], (Cout,), jnp.float32)
    bn_params = (gamma, beta, mean, var)
    ref_bn = _reference(x, w, batch_norm=True, bn_params=bn_params)
    out_bn = block_forward(x, w, bn_params, batch_norm=True,
                           compute_dtype=jnp.float32)
    jax.block_until_ready(out_bn)
    assert jnp.allclose(out_bn, ref_bn, atol=1e-4, rtol=1e-4), "bn mismatch"

    # NHWC end-to-end (no wrapper transposes)
    x_nhwc = jnp.transpose(x, (0, 2, 3, 1))
    out_nhwc = block_forward(x_nhwc, w, batch_norm=False,
                             compute_dtype=jnp.float32, data_format="NHWC")
    jax.block_until_ready(out_nhwc)
    assert jnp.allclose(jnp.transpose(out_nhwc, (0, 3, 1, 2)), ref,
                        atol=1e-4, rtol=1e-4), "NHWC path mismatch"

    # --- Case 2: multi-H-tile resident grid + manual-DMA fallback ----------
    N2, Cin2, Cout2, H2, W2 = 2, 8, 16, 32, 32
    x2 = jax.random.normal(ks[6], (N2, Cin2, H2, W2), jnp.float32)
    w2 = jax.random.normal(ks[7], (Cout2, Cin2, 3, 3), jnp.float32) * math.sqrt(
        2.0 / (Cin2 * 9))
    ref2 = _reference(x2, w2, batch_norm=False)

    out2 = block_forward(x2, w2, batch_norm=False, compute_dtype=jnp.float32,
                         tile_h=8)                      # grid (2, 4), resident
    jax.block_until_ready(out2)
    assert out2.shape == (N2, Cout2, H2, W2)
    assert jnp.allclose(out2, ref2, atol=1e-4, rtol=1e-4), "tiled-grid mismatch"

    out3 = block_forward(x2, w2, batch_norm=False, compute_dtype=jnp.float32,
                         tile_h=8, force_manual_dma=True)   # pl.ANY + sync_copy
    jax.block_until_ready(out3)
    assert jnp.allclose(out3, ref2, atol=1e-4, rtol=1e-4), "manual-DMA mismatch"

    print("KERNEL_OK")
</pallas_src>

<mosaic_0001>
module attributes {stable_mosaic.version = 11 : i64} {
  func.func @_resident_kernel(%arg0: i32, %arg1: i32, %arg2: memref<1x18x18x4xf32, #tpu.memory_space<vmem>>, %arg3: memref<3x3x4x128xf32, #tpu.memory_space<vmem>>, %arg4: memref<1x128xf32, #tpu.memory_space<vmem>>, %arg5: memref<1x256x128xf32, #tpu.memory_space<vmem>>) attributes {dimension_semantics = [#tpu.dimension_semantics<parallel>, #tpu.dimension_semantics<parallel>], iteration_bounds = array<i64: 2, 1>, scalar_prefetch = 0 : i64, scratch_operands = 0 : i64, tpu.core_type = #tpu.core_type<tc>, window_params = [{transform_indices = @transform_0, window_bounds = array<i64: 1, 18, 18, 4>}, {pipeline_mode = #tpu.pipeline_mode<synchronous>, transform_indices = @transform_1, window_bounds = array<i64: 3, 3, 4, 128>}, {pipeline_mode = #tpu.pipeline_mode<synchronous>, transform_indices = @transform_2, window_bounds = array<i64: 1, 128>}, {transform_indices = @transform_3, window_bounds = array<i64: 1, 256, 128>}]} {
    %c16_i32 = arith.constant 16 : i32
    %0 = arith.muli %arg1, %c16_i32 : i32
    %cst = arith.constant 0.000000e+00 : f32
    %1 = vector.broadcast %cst : f32 to vector<256x128xf32>
    %c0_i32 = arith.constant 0 : i32
    %2 = arith.addi %0, %c0_i32 : i32
    %c0 = arith.constant 0 : index
    %3 = arith.index_cast %2 : i32 to index
    %c0_0 = arith.constant 0 : index
    %c0_1 = arith.constant 0 : index
    %4 = vector.load %arg2[%c0, %3, %c0_0, %c0_1] : memref<1x18x18x4xf32, #tpu.memory_space<vmem>>, vector<1x16x18x4xf32>
    %5 = vector.shape_cast %4 : vector<1x16x18x4xf32> to vector<16x18x4xf32>
    %6 = vector.extract_strided_slice %5 {offsets = [0, 0, 0], sizes = [16, 16, 4], strides = [1, 1, 1]} : vector<16x18x4xf32> to vector<16x16x4xf32>
    %7 = vector.shape_cast %6 : vector<16x16x4xf32> to vector<256x4xf32>
    %c0_2 = arith.constant 0 : index
    %c0_3 = arith.constant 0 : index
    %c0_4 = arith.constant 0 : index
    %c0_5 = arith.constant 0 : index
    %8 = vector.load %arg3[%c0_2, %c0_3, %c0_4, %c0_5] : memref<3x3x4x128xf32, #tpu.memory_space<vmem>>, vector<1x1x4x128xf32>
    %9 = vector.shape_cast %8 : vector<1x1x4x128xf32> to vector<4x128xf32>
    %cst_6 = arith.constant dense<0.000000e+00> : vector<256x128xf32>
    %10 = tpu.matmul %7, %9, %cst_6 {dimension_numbers = #tpu.dot_dimension_numbers<[1], [0], [0], [1], [0, 0, 1, 1], [], []>} : vector<256x4xf32>, vector<4x128xf32>, vector<256x128xf32> -> vector<256x128xf32>
    %11 = arith.addf %1, %10 : vector<256x128xf32>
    %12 = vector.extract_strided_slice %5 {offsets = [0, 1, 0], sizes = [16, 16, 4], strides = [1, 1, 1]} : vector<16x18x4xf32> to vector<16x16x4xf32>
    %13 = vector.shape_cast %12 : vector<16x16x4xf32> to vector<256x4xf32>
    %c0_7 = arith.constant 0 : index
    %c1 = arith.constant 1 : index
    %c0_8 = arith.constant 0 : index
    %c0_9 = arith.constant 0 : index
    %14 = vector.load %arg3[%c0_7, %c1, %c0_8, %c0_9] : memref<3x3x4x128xf32, #tpu.memory_space<vmem>>, vector<1x1x4x128xf32>
    %15 = vector.shape_cast %14 : vector<1x1x4x128xf32> to vector<4x128xf32>
    %cst_10 = arith.constant dense<0.000000e+00> : vector<256x128xf32>
    %16 = tpu.matmul %13, %15, %cst_10 {dimension_numbers = #tpu.dot_dimension_numbers<[1], [0], [0], [1], [0, 0, 1, 1], [], []>} : vector<256x4xf32>, vector<4x128xf32>, vector<256x128xf32> -> vector<256x128xf32>
    %17 = arith.addf %11, %16 : vector<256x128xf32>
    %18 = vector.extract_strided_slice %5 {offsets = [0, 2, 0], sizes = [16, 16, 4], strides = [1, 1, 1]} : vector<16x18x4xf32> to vector<16x16x4xf32>
    %19 = vector.shape_cast %18 : vector<16x16x4xf32> to vector<256x4xf32>
    %c0_11 = arith.constant 0 : index
    %c2 = arith.constant 2 : index
    %c0_12 = arith.constant 0 : index
    %c0_13 = arith.constant 0 : index
    %20 = vector.load %arg3[%c0_11, %c2, %c0_12, %c0_13] : memref<3x3x4x128xf32, #tpu.memory_space<vmem>>, vector<1x1x4x128xf32>
    %21 = vector.shape_cast %20 : vector<1x1x4x128xf32> to vector<4x128xf32>
    %cst_14 = arith.constant dense<0.000000e+00> : vector<256x128xf32>
    %22 = tpu.matmul %19, %21, %cst_14 {dimension_numbers = #tpu.dot_dimension_numbers<[1], [0], [0], [1], [0, 0, 1, 1], [], []>} : vector<256x4xf32>, vector<4x128xf32>, vector<256x128xf32> -> vector<256x128xf32>
    %23 = arith.addf %17, %22 : vector<256x128xf32>
    %c1_i32 = arith.constant 1 : i32
    %24 = arith.addi %0, %c1_i32 : i32
    %c0_15 = arith.constant 0 : index
    %25 = arith.index_cast %24 : i32 to index
    %c0_16 = arith.constant 0 : index
    %c0_17 = arith.constant 0 : index
    %26 = vector.load %arg2[%c0_15, %25, %c0_16, %c0_17] : memref<1x18x18x4xf32, #tpu.memory_space<vmem>>, vector<1x16x18x4xf32>
    %27 = vector.shape_cast %26 : vector<1x16x18x4xf32> to vector<16x18x4xf32>
    %28 = vector.extract_strided_slice %27 {offsets = [0, 0, 0], sizes = [16, 16, 4], strides = [1, 1, 1]} : vector<16x18x4xf32> to vector<16x16x4xf32>
    %29 = vector.shape_cast %28 : vector<16x16x4xf32> to vector<256x4xf32>
    %c1_18 = arith.constant 1 : index
    %c0_19 = arith.constant 0 : index
    %c0_20 = arith.constant 0 : index
    %c0_21 = arith.constant 0 : index
    %30 = vector.load %arg3[%c1_18, %c0_19, %c0_20, %c0_21] : memref<3x3x4x128xf32, #tpu.memory_space<vmem>>, vector<1x1x4x128xf32>
    %31 = vector.shape_cast %30 : vector<1x1x4x128xf32> to vector<4x128xf32>
    %cst_22 = arith.constant dense<0.000000e+00> : vector<256x128xf32>
    %32 = tpu.matmul %29, %31, %cst_22 {dimension_numbers = #tpu.dot_dimension_numbers<[1], [0], [0], [1], [0, 0, 1, 1], [], []>} : vector<256x4xf32>, vector<4x128xf32>, vector<256x128xf32> -> vector<256x128xf32>
    %33 = arith.addf %23, %32 : vector<256x128xf32>
    %34 = vector.extract_strided_slice %27 {offsets = [0, 1, 0], sizes = [16, 16, 4], strides = [1, 1, 1]} : vector<16x18x4xf32> to vector<16x16x4xf32>
    %35 = vector.shape_cast %34 : vector<16x16x4xf32> to vector<256x4xf32>
    %c1_23 = arith.constant 1 : index
    %c1_24 = arith.constant 1 : index
    %c0_25 = arith.constant 0 : index
    %c0_26 = arith.constant 0 : index
    %36 = vector.load %arg3[%c1_23, %c1_24, %c0_25, %c0_26] : memref<3x3x4x128xf32, #tpu.memory_space<vmem>>, vector<1x1x4x128xf32>
    %37 = vector.shape_cast %36 : vector<1x1x4x128xf32> to vector<4x128xf32>
    %cst_27 = arith.constant dense<0.000000e+00> : vector<256x128xf32>
    %38 = tpu.matmul %35, %37, %cst_27 {dimension_numbers = #tpu.dot_dimension_numbers<[1], [0], [0], [1], [0, 0, 1, 1], [], []>} : vector<256x4xf32>, vector<4x128xf32>, vector<256x128xf32> -> vector<256x128xf32>
    %39 = arith.addf %33, %38 : vector<256x128xf32>
    %40 = vector.extract_strided_slice %27 {offsets = [0, 2, 0], sizes = [16, 16, 4], strides = [1, 1, 1]} : vector<16x18x4xf32> to vector<16x16x4xf32>
    %41 = vector.shape_cast %40 : vector<16x16x4xf32> to vector<256x4xf32>
    %c1_28 = arith.constant 1 : index
    %c2_29 = arith.constant 2 : index
    %c0_30 = arith.constant 0 : index
    %c0_31 = arith.constant 0 : index
    %42 = vector.load %arg3[%c1_28, %c2_29, %c0_30, %c0_31] : memref<3x3x4x128xf32, #tpu.memory_space<vmem>>, vector<1x1x4x128xf32>
    %43 = vector.shape_cast %42 : vector<1x1x4x128xf32> to vector<4x128xf32>
    %cst_32 = arith.constant dense<0.000000e+00> : vector<256x128xf32>
    %44 = tpu.matmul %41, %43, %cst_32 {dimension_numbers = #tpu.dot_dimension_numbers<[1], [0], [0], [1], [0, 0, 1, 1], [], []>} : vector<256x4xf32>, vector<4x128xf32>, vector<256x128xf32> -> vector<256x128xf32>
    %45 = arith.addf %39, %44 : vector<256x128xf32>
    %c2_i32 = arith.constant 2 : i32
    %46 = arith.addi %0, %c2_i32 : i32
    %c0_33 = arith.constant 0 : index
    %47 = arith.index_cast %46 : i32 to index
    %c0_34 = arith.constant 0 : index
    %c0_35 = arith.constant 0 : index
    %48 = vector.load %arg2[%c0_33, %47, %c0_34, %c0_35] : memref<1x18x18x4xf32, #tpu.memory_space<vmem>>, vector<1x16x18x4xf32>
    %49 = vector.shape_cast %48 : vector<1x16x18x4xf32> to vector<16x18x4xf32>
    %50 = vector.extract_strided_slice %49 {offsets = [0, 0, 0], sizes = [16, 16, 4], strides = [1, 1, 1]} : vector<16x18x4xf32> to vector<16x16x4xf32>
    %51 = vector.shape_cast %50 : vector<16x16x4xf32> to vector<256x4xf32>
    %c2_36 = arith.constant 2 : index
    %c0_37 = arith.constant 0 : index
    %c0_38 = arith.constant 0 : index
    %c0_39 = arith.constant 0 : index
    %52 = vector.load %arg3[%c2_36, %c0_37, %c0_38, %c0_39] : memref<3x3x4x128xf32, #tpu.memory_space<vmem>>, vector<1x1x4x128xf32>
    %53 = vector.shape_cast %52 : vector<1x1x4x128xf32> to vector<4x128xf32>
    %cst_40 = arith.constant dense<0.000000e+00> : vector<256x128xf32>
    %54 = tpu.matmul %51, %53, %cst_40 {dimension_numbers = #tpu.dot_dimension_numbers<[1], [0], [0], [1], [0, 0, 1, 1], [], []>} : vector<256x4xf32>, vector<4x128xf32>, vector<256x128xf32> -> vector<256x128xf32>
    %55 = arith.addf %45, %54 : vector<256x128xf32>
    %56 = vector.extract_strided_slice %49 {offsets = [0, 1, 0], sizes = [16, 16, 4], strides = [1, 1, 1]} : vector<16x18x4xf32> to vector<16x16x4xf32>
    %57 = vector.shape_cast %56 : vector<16x16x4xf32> to vector<256x4xf32>
    %c2_41 = arith.constant 2 : index
    %c1_42 = arith.constant 1 : index
    %c0_43 = arith.constant 0 : index
    %c0_44 = arith.constant 0 : index
    %58 = vector.load %arg3[%c2_41, %c1_42, %c0_43, %c0_44] : memref<3x3x4x128xf32, #tpu.memory_space<vmem>>, vector<1x1x4x128xf32>
    %59 = vector.shape_cast %58 : vector<1x1x4x128xf32> to vector<4x128xf32>
    %cst_45 = arith.constant dense<0.000000e+00> : vector<256x128xf32>
    %60 = tpu.matmul %57, %59, %cst_45 {dimension_numbers = #tpu.dot_dimension_numbers<[1], [0], [0], [1], [0, 0, 1, 1], [], []>} : vector<256x4xf32>, vector<4x128xf32>, vector<256x128xf32> -> vector<256x128xf32>
    %61 = arith.addf %55, %60 : vector<256x128xf32>
    %62 = vector.extract_strided_slice %49 {offsets = [0, 2, 0], sizes = [16, 16, 4], strides = [1, 1, 1]} : vector<16x18x4xf32> to vector<16x16x4xf32>
    %63 = vector.shape_cast %62 : vector<16x16x4xf32> to vector<256x4xf32>
    %c2_46 = arith.constant 2 : index
    %c2_47 = arith.constant 2 : index
    %c0_48 = arith.constant 0 : index
    %c0_49 = arith.constant 0 : index
    %64 = vector.load %arg3[%c2_46, %c2_47, %c0_48, %c0_49] : memref<3x3x4x128xf32, #tpu.memory_space<vmem>>, vector<1x1x4x128xf32>
    %65 = vector.shape_cast %64 : vector<1x1x4x128xf32> to vector<4x128xf32>
    %cst_50 = arith.constant dense<0.000000e+00> : vector<256x128xf32>
    %66 = tpu.matmul %63, %65, %cst_50 {dimension_numbers = #tpu.dot_dimension_numbers<[1], [0], [0], [1], [0, 0, 1, 1], [], []>} : vector<256x4xf32>, vector<4x128xf32>, vector<256x128xf32> -> vector<256x128xf32>
    %67 = arith.addf %61, %66 : vector<256x128xf32>
    %c0_51 = arith.constant 0 : index
    %c0_52 = arith.constant 0 : index
    %68 = vector.load %arg4[%c0_51, %c0_52] : memref<1x128xf32, #tpu.memory_space<vmem>>, vector<1x128xf32>
    %69 = vector.shape_cast %68 : vector<1x128xf32> to vector<128xf32>
    %70 = vector.shape_cast %69 : vector<128xf32> to vector<1x128xf32>
    %71 = vector.broadcast %70 : vector<1x128xf32> to vector<256x128xf32>
    %72 = arith.addf %67, %71 : vector<256x128xf32>
    %cst_53 = arith.constant 0.000000e+00 : f32
    %73 = vector.broadcast %cst_53 : f32 to vector<256x128xf32>
    %74 = arith.maximumf %72, %73 : vector<256x128xf32>
    %c0_54 = arith.constant 0 : index
    %c0_55 = arith.constant 0 : index
    %c0_56 = arith.constant 0 : index
    %75 = vector.load %arg5[%c0_54, %c0_55, %c0_56] : memref<1x256x128xf32, #tpu.memory_space<vmem>>, vector<1x256x128xf32>
    %76 = vector.shape_cast %75 : vector<1x256x128xf32> to vector<256x128xf32>
    %77 = vector.shape_cast %74 : vector<256x128xf32> to vector<1x256x128xf32>
    tpu.vector_store %arg5[%c0_54, %c0_55, %c0_56], %77 {strides = array<i32>} : memref<1x256x128xf32, #tpu.memory_space<vmem>>, vector<1x256x128xf32>,
    return
  }
  func.func @transform_0(%arg0: i32, %arg1: i32) -> (i32, i32, i32, i32) {
    %c0_i32 = arith.constant 0 : i32
    %c0_i32_0 = arith.constant 0 : i32
    %c0_i32_1 = arith.constant 0 : i32
    %c0_i32_2 = arith.constant 0 : i32
    return %arg0, %c0_i32, %c0_i32_0, %c0_i32_1 : i32, i32, i32, i32
  }
  func.func @transform_1(%arg0: i32, %arg1: i32) -> (i32, i32, i32, i32) {
    %c0_i32 = arith.constant 0 : i32
    %c0_i32_0 = arith.constant 0 : i32
    %c0_i32_1 = arith.constant 0 : i32
    %c0_i32_2 = arith.constant 0 : i32
    %c0_i32_3 = arith.constant 0 : i32
    return %c0_i32, %c0_i32_0, %c0_i32_1, %c0_i32_2 : i32, i32, i32, i32
  }
  func.func @transform_2(%arg0: i32, %arg1: i32) -> (i32, i32) {
    %c0_i32 = arith.constant 0 : i32
    %c0_i32_0 = arith.constant 0 : i32
    %c0_i32_1 = arith.constant 0 : i32
    return %c0_i32, %c0_i32_0 : i32, i32
  }
  func.func @transform_3(%arg0: i32, %arg1: i32) -> (i32, i32, i32) {
    %c0_i32 = arith.constant 0 : i32
    %c0_i32_0 = arith.constant 0 : i32
    return %arg0, %arg1, %c0_i32 : i32, i32, i32
  }
}

</mosaic_0001>

<bundles_post_ra>
// kernel: block_forward.1
= control target key start
LH: loop header
LB: loop body
LE: loop exit
PB: predicated region body
PF: predicated region fallthrough
CT: control target
= control target key end

     0   :  { %s3528_s12 = smov 0   ;;  %s3530_s13 = smov 0   ;;  %s4988_s0 = inlined_call_operand.vmem [shape: f32[2,18,18,4], index: 0, kind: input, shape index: {}]   ;;  %s4989_s1 = inlined_call_operand.vmem [shape: f32[3,3,4,128], index: 1, kind: input, shape index: {}]   ;;  %s4990_s2 = inlined_call_operand.vmem [shape: f32[1,128], index: 2, kind: input, shape index: {}]   ;;  %s4991_s3 = inlined_call_operand.vmem [shape: f32[2,256,128], index: 3, kind: output, shape index: {}]  }
   0x1   :  { %s3532_s14 = smov 0  }
   0x2 LB: > { %s25_s15 = sadd.s32 1, %s3502_s13  ;;  %p3031_p0 = scmp.ge.s32.totalorder %s3506_s14, 1  ;;  %s3506_s14 = sphi %s3532_s14, %s13_s14   ;;  %s3502_s13 = sphi %s3530_s13, %s5123_s13   ;;  %s3498_s12 = sphi %s3528_s12, %s5122_s12  }
   0x3   : > { %p27_p1 = scmp.ge.s32.totalorder %s25_s15, 2  ;;  %p151_p2 = scmp.lt.s32.totalorder %s3506_s14, 3 }
   0x5   : > { %s5125_s15 = smov (%p27_p1, %s25_s15), 0  ;;  %p152_p3 = pnand %p3031_p0, %p151_p2 }
   0x7   : > { %155 = sbr.rel (%p152_p3) target bundleno = 734 (0x2de), region = 32 }
   0xc   : > { %v3035_v0 = vld [vmem:[%s4989_s1 + $0x4] sm:$0xf]  ;;  %vm442_vm0 = vcmask 1043456   ;;  %p179_p4 = scmp.lt.s32.totalorder %s3498_s12, 1  ;;  %v3102_v1 = vld [vmem:[%s4989_s1 + $0x8] sm:$0xf] }
   0xd   : > { %3439 = vmatpush.msk.msra.mxu1 %vm442_vm0, %v3035_v0  ;;  %3440 = vmatpush.msk.msra.mxu2 %vm442_vm0, %v3035_v0  ;;  %v3184_v2 = vld [vmem:[%s4989_s1 + $0xc] sm:$0xf]  ;;  %v245_v3 = vld [vmem:[%s4989_s1] sm:$0xf]  ;;  %v3218_v4 = vld [vmem:[%s4989_s1 + $0x10] sm:$0xf] }
   0xe   : > { %s5127_s12 = smov (!%p179_p4, %s3498_s12), 1  ;;  %3441 = vmatpush.msk.msra.mxu3 %vm442_vm0, %v3035_v0  ;;  %3036 = vmatpush.msk.msra.mxu0 %vm442_vm0, %v3035_v0  ;;  %vm294_vm1 = vcmask 1046528   ;;  %vm377_vm2 = vcmask 31744   ;;  %vm739_vm3 = vcmask 1045504  }
   0xf   : > { %3103 = vmatpush.msk.msrb.mxu2 %vm442_vm0, %v3102_v1  ;;  %3069 = vmatpush.msk.msrb.mxu1 %vm442_vm0, %v245_v3  ;;  %s3442_s26 = smul.u32 432, %s5127_s12  ;;  %s3438_s17 = sshll.u32 %s5127_s12, 8 }
  0x10   : > { %3185 = vmatpush.msk.msrb.mxu3 %vm442_vm0, %v3184_v2  ;;  %3219 = vmatpush.msk.msrb.mxu0 %vm442_vm0, %v3218_v4  ;;  %s4738_s20 = scalar_lea.vmem %s4991_s3, %s3438_s17 }
  0x11   : > { %s3575_s29 = scalar_lea.vmem %s4988_s0, %s3442_s26 }
  0x12   : > { %v3578_v5 = vld [vmem:[%s3575_s29 + $0x60] sm:$0xff]  ;;  %v3581_v6 = vld [vmem:[%s3575_s29 + $0x68] sm:$0xff]  ;;  %v3606_v17 = vld [vmem:[%s3575_s29 + $0x70] sm:$0x3] }
  0x13   : > { %v3584_v7 = vld [vmem:[%s3575_s29 + $0xc0] sm:$0xff]  ;;  %v315_v8 = vrot.slane %v3578_v5, 1  ;;  %v3588_v9 = vrot.slane %v3581_v6, 1  ;;  %v3591_v10 = vld [vmem:[%s3575_s29 + $0xc8] sm:$0xff]  ;;  %v3616_v20 = vld [vmem:[%s3575_s29 + $0xd0] sm:$0x3] }
  0x14   : > { %v335_v11 = vrot.slane %v3584_v7, 1  ;;  %v3595_v12 = vld [vmem:[%s3575_s29 + $0x120] sm:$0xff]  ;;  %v3598_v13 = vld [vmem:[%s3575_s29 + $0x128] sm:$0xff]  ;;  %v3601_v14 = vrot.slane %v3591_v10, 1  ;;  %v3633_v26 = vld [vmem:[%s3575_s29 + $0x130] sm:$0x3] }
  0x15   : > { %5034 = vst [vmem:[#allocation2_spill] sm:$0xff] %v3595_v12  ;;  %v4992_v15 = vrot.slane %v3595_v12, 1  ;;  %v356_v16 = vrot.slane %v3598_v13, 1  ;;  %v3609_v18 = vld [vmem:[%s3575_s29] sm:$0xff]  ;;  %v3613_v19 = vsel %vm294_vm1, %v315_v8, %v3588_v9  ;;  %v3619_v21 = vld [vmem:[%s3575_s29 + $0x8] sm:$0xff]  ;;  %v318_v27 = vrot.slane %v3606_v17, 1 }
  0x16   : > { %5035 = vst [vmem:[#allocation3_spill] sm:$0xff] %v3598_v13  ;;  %v295_v22 = vrot.slane %v3609_v18, 1  ;;  %3045 = vmatmul.msk.f32.vlgmr.msra.gmra.mxu1 %vm377_vm2, %v3613_v19  ;;  %v3626_v23 = vsel %vm294_vm1, %v335_v11, %v3601_v14  ;;  %v296_v25 = vrot.slane %v3619_v21, 1  ;;  %v3640_v28 = vld [vmem:[%s3575_s29 + $0x10] sm:$0x3]  ;;  %v338_v29 = vrot.slane %v3616_v20, 1 }
  0x17   : > { %v357_v24 = vsel %vm294_vm1, %v4992_v15, %v356_v16  ;;  %5036 = vst [vmem:[#allocation4_spill] sm:$0xff] %v3633_v26  ;;  %3053 = vmatmul.msk.f32.vlgmr.msra.gmra.mxu2 %vm377_vm2, %v3626_v23  ;;  %v358_v31 = vrot.slane %v3633_v26, 1  ;;  %v298_v32 = vrot.slane %v3640_v28, 1  ;;  %v319_v33 = vsel %vm294_vm1, %v3588_v9, %v318_v27  ;;  %v3653_v36 = vld [vmem:[%s3575_s29 + $0x78] sm:$0xff]  ;;  %v3656_v37 = vld [vmem:[%s3575_s29 + $0x80] sm:$0xff]  ;;  %v3744_v4 = vld [vmem:[%s3575_s29 + $0x90] sm:$0xff] }
  0x18   : > { %3061 = vmatmul.msk.f32.vlgmr.msra.gmra.mxu3 %vm377_vm2, %v357_v24  ;;  %v297_v30 = vsel %vm294_vm1, %v295_v22, %v296_v25  ;;  %v339_v34 = vsel %vm294_vm1, %v3601_v14, %v338_v29  ;;  %v3659_v38 = vld [vmem:[%s3575_s29 + $0xd8] sm:$0xff]  ;;  %v3662_v39 = vld [vmem:[%s3575_s29 + $0xe0] sm:$0xff]  ;;  %v320_v43 = vrot.slane %v3653_v36, 1  ;;  %v3676_v44 = vrot.slane %v3656_v37, 1  ;;  %v3710_v56 = vld [vmem:[%s3575_s29 + $0x88] sm:$0x3] }
  0x19   : > { %3037 = vmatmul.msk.f32.vlgmr.msra.gmra.mxu0 %vm377_vm2, %v297_v30  ;;  %v359_v35 = vsel %vm294_vm1, %v356_v16, %v358_v31  ;;  %v3665_v40 = vld [vmem:[%s3575_s29 + $0x138] sm:$0xff]  ;;  %v3668_v41 = vld [vmem:[%s3575_s29 + $0x140] sm:$0xff]  ;;  %v299_v42 = vsel %vm294_vm1, %v296_v25, %v298_v32  ;;  %v340_v47 = vrot.slane %v3659_v38, 1  ;;  %v3686_v48 = vrot.slane %v3662_v39, 1  ;;  %v3713_v57 = vld [vmem:[%s3575_s29 + $0xe8] sm:$0x3] }
  0x1a   : > { %5037 = vst [vmem:[#allocation5_spill] sm:$0xff] %v3665_v40  ;;  %v3679_v45 = vld [vmem:[%s3575_s29 + $0x18] sm:$0xff]  ;;  %v3682_v46 = vld [vmem:[%s3575_s29 + $0x20] sm:$0xff]  ;;  %v360_v49 = vrot.slane %v3665_v40, 1  ;;  %v3690_v50 = vrot.slane %v3668_v41, 1  ;;  %v3699_v53 = vsel %vm294_vm1, %v320_v43, %v3676_v44  ;;  %v323_v60 = vrot.slane %v3710_v56, 1 }
  0x1b   : > { %5038 = vst [vmem:[#allocation6_spill] sm:$0xff] %v3668_v41  ;;  %v300_v51 = vrot.slane %v3679_v45, 1  ;;  %v3695_v52 = vrot.slane %v3682_v46, 1  ;;  %v3703_v54 = vsel %vm294_vm1, %v340_v47, %v3686_v48  ;;  %v3716_v58 = vld [vmem:[%s3575_s29 + $0x148] sm:$0x3]  ;;  %v343_v62 = vrot.slane %v3713_v57, 1 }
  0x1c   : > { %5039 = vst [vmem:[#allocation7_spill] sm:$0xff] %v3690_v50  ;;  %v3707_v55 = vsel %vm294_vm1, %v360_v49, %v3690_v50  ;;  %v3730_v61 = vld [vmem:[%s3575_s29 + $0x28] sm:$0x3]  ;;  %v363_v63 = vrot.slane %v3716_v58, 1  ;;  %v324_v1 = vsel %vm294_vm1, %v3676_v44, %v323_v60  ;;  %v3747_v8 = vld [vmem:[%s3575_s29 + $0x98] sm:$0xff]  ;;  %v3750_v11 = vld [vmem:[%s3575_s29 + $0xf0] sm:$0xff] }
  0x1d   : > { %5040 = vst [vmem:[#allocation8_spill] sm:$0xff] %v3707_v55  ;;  %v3722_v59 = vsel %vm294_vm1, %v300_v51, %v3695_v52  ;;  %v303_v0 = vrot.slane %v3730_v61, 1  ;;  %v344_v2 = vsel %vm294_vm1, %v3686_v48, %v343_v62  ;;  %v3753_v16 = vld [vmem:[%s3575_s29 + $0xf8] sm:$0xff]  ;;  %v3756_v22 = vld [vmem:[%s3575_s29 + $0x150] sm:$0xff]  ;;  %v325_v27 = vrot.slane %v3744_v4, 1 }
  0x1e   : > { %3046 = vmatmul.msk.f32.gmra.mxu1 %vm377_vm2, %v319_v33  ;;  %5041 = vst [vmem:[#allocation9_spill] sm:$0xff] %v3716_v58  ;;  %v364_v3 = vsel %vm294_vm1, %v3690_v50, %v363_v63  ;;  %v3759_v24 = vld [vmem:[%s3575_s29 + $0x158] sm:$0xff]  ;;  %v3768_v29 = vrot.slane %v3747_v8, 1  ;;  %v3771_v30 = vld [vmem:[%s3575_s29 + $0x30] sm:$0xff]  ;;  %v345_v32 = vrot.slane %v3750_v11, 1  ;;  %v3778_v33 = vrot.slane %v3753_v16, 1 }
  0x1f   : > { %3054 = vmatmul.msk.f32.gmra.mxu2 %vm377_vm2, %v339_v34  ;;  %5042 = vst [vmem:[#allocation10_spill] sm:$0xff] %v3756_v22  ;;  %v304_v25 = vsel %vm294_vm1, %v3695_v52, %v303_v0  ;;  %v3774_v31 = vld [vmem:[%s3575_s29 + $0x38] sm:$0xff]  ;;  %v365_v34 = vrot.slane %v3756_v22, 1  ;;  %v3794_v49 = vld [vmem:[%s3575_s29 + $0xa0] sm:$0x3]  ;;  %v3860_v58 = vld [vmem:[%s3575_s29 + $0x168] sm:$0xff] }
  0x20   : > { %3062 = vmatmul.msk.f32.gmra.mxu3 %vm377_vm2, %v359_v35  ;;  %5043 = vst [vmem:[#allocation11_spill] sm:$0xff] %v3759_v24  ;;  %v3782_v35 = vrot.slane %v3759_v24, 1  ;;  %v3787_v43 = vrot.slane %v3774_v31, 1  ;;  %v3791_v47 = vsel %vm294_vm1, %v325_v27, %v3768_v29  ;;  %v3798_v51 = vsel %vm294_vm1, %v345_v32, %v3778_v33  ;;  %v3805_v62 = vld [vmem:[%s3575_s29 + $0x100] sm:$0x3]  ;;  %v3851_v24 = vld [vmem:[%s3575_s29 + $0xb0] sm:$0xff] }
  0x21   : > { %3038 = vmatmul.msk.f32.gmra.mxu0 %vm377_vm2, %v299_v42  ;;  %v305_v42 = vrot.slane %v3771_v30, 1  ;;  %5046 = vst [vmem:[#allocation14_spill] sm:$0xff] %v3805_v62  ;;  %v3808_v63 = vld [vmem:[%s3575_s29 + $0x160] sm:$0x3]  ;;  %v328_v0 = vrot.slane %v3794_v49, 1  ;;  %v348_v27 = vrot.slane %v3805_v62, 1 }
  0x22   : > { %5044 = vst [vmem:[#allocation12_spill] sm:$0xff] %v3782_v35  ;;  %v3802_v60 = vsel %vm294_vm1, %v365_v34, %v3782_v35  ;;  %v368_v32 = vrot.slane %v3808_v63, 1  ;;  %v3252_v34 = vld [vmem:[%s4989_s1 + $0x14] sm:$0xf]  ;;  %v3916_v13 = vld [vmem:[%s3575_s29 + $0x178] sm:$0x3] }
  0x23   : > { %5045 = vst [vmem:[#allocation13_spill] sm:$0xff] %v3802_v60  ;;  %3253 = vmatpush.msk.msra.mxu1 %vm442_vm0, %v3252_v34  ;;  %v329_v15 = vsel %vm294_vm1, %v3768_v29, %v328_v0  ;;  %v3857_v34 = vld [vmem:[%s3575_s29 + $0x110] sm:$0xff] }
  0x24   : > { %5047 = vst [vmem:[#allocation15_spill] sm:$0xff] %v3808_v63  ;;  %v3848_v63 = vld [vmem:[%s3575_s29 + $0xa8] sm:$0xff]  ;;  %v3863_v22 = vld [vmem:[%s3575_s29 + $0x170] sm:$0xff] }
  0x25   : > { %5049 = vst [vmem:[#allocation17_spill] sm:$0xff] %v3857_v34  ;;  %v3878_v41 = vld [vmem:[%s3575_s29 + $0x50] sm:$0xff]  ;;  %v3889_v50 = vrot.slane %v3863_v22, 1 }
  0x26   : > { %3047 = vmatmul.msk.f32.gmra.mxu1 %vm377_vm2, %v3699_v53  ;;  %5050 = vst [vmem:[#allocation18_spill] sm:$0xff] %v3860_v58  ;;  %v3895_v26 = vrot.slane %v3878_v41, 1 }
  0x27   : > { %3055 = vmatmul.msk.f32.gmra.mxu2 %vm377_vm2, %v3703_v54  ;;  %5051 = vst [vmem:[#allocation19_spill] sm:$0xff] %v3863_v22 }
  0x28   : > { %3063 = vmatmul.msk.f32.gmra.mxu3 %vm377_vm2, %v3707_v55  ;;  %5055 = vst [vmem:[#allocation23_spill] sm:$0xff] %v3916_v13 }
  0x29   : > { %3039 = vmatmul.msk.f32.gmra.mxu0 %vm377_vm2, %v3722_v59 }
  0x2e   : > { %3048 = vmatmul.msk.f32.gmra.mxu1 %vm377_vm2, %v324_v1  ;;  %v3815_v1 = vsel %vm294_vm1, %v305_v42, %v3787_v43 }
  0x2f   : > { %3056 = vmatmul.msk.f32.gmra.mxu2 %vm377_vm2, %v344_v2  ;;  %v3822_v2 = vld [vmem:[%s3575_s29 + $0x40] sm:$0x3] }
  0x30   : > { %3064 = vmatmul.msk.f32.gmra.mxu3 %vm377_vm2, %v364_v3  ;;  %v3334_v3 = vld [vmem:[%s4989_s1 + $0x18] sm:$0xf]  ;;  %v308_v42 = vrot.slane %v3822_v2, 1 }
  0x31   : > { %3040 = vmatmul.msk.f32.gmra.mxu0 %vm377_vm2, %v304_v25  ;;  %v3368_v25 = vld [vmem:[%s4989_s1 + $0x1c] sm:$0xf]  ;;  %3335 = vmatpush.msk.msra.mxu2 %vm442_vm0, %v3334_v3  ;;  %v349_v3 = vsel %vm294_vm1, %v3778_v33, %v348_v27  ;;  %v330_v27 = vrot.slane %v3848_v63, 1 }
  0x32   : > { %3369 = vmatpush.msk.msra.mxu3 %vm442_vm0, %v3368_v25  ;;  %v369_v25 = vsel %vm294_vm1, %v3782_v35, %v368_v32  ;;  %v309_v0 = vsel %vm294_vm1, %v3787_v43, %v308_v42  ;;  %v3872_v32 = vrot.slane %v3851_v24, 1  ;;  %v3875_v35 = vld [vmem:[%s3575_s29 + $0x48] sm:$0xff] }
  0x33   : > { %v310_v55 = vrot.slane %v3875_v35, 1 }
  0x34   : > { %v3899_v40 = vsel %vm294_vm1, %v330_v27, %v3872_v32 }
  0x35   : > { %v312_v27 = vsel %vm294_vm1, %v310_v55, %v3895_v26 }
  0x36   : > { %3049 = vmatmul.msk.f32.gmra.mxu1 %vm377_vm2, %v3791_v47 }
  0x37   : > { %3057 = vmatmul.msk.f32.gmra.mxu2 %vm377_vm2, %v3798_v51 }
  0x38   : > { %3065 = vmatmul.msk.f32.gmra.mxu3 %vm377_vm2, %v3802_v60  ;;  %v3854_v60 = vld [vmem:[%s3575_s29 + $0x108] sm:$0xff] }
  0x39   : > { %3041 = vmatmul.msk.f32.gmra.mxu0 %vm377_vm2, %v3815_v1  ;;  %5048 = vst [vmem:[#allocation16_spill] sm:$0xff] %v3854_v60  ;;  %v350_v42 = vrot.slane %v3854_v60, 1  ;;  %v741_v60 = vrot.slane %v3619_v21, 2 }
  0x3e   : > { %3050 = vmatmul.msk.f32.gmra.mxu1 %vm377_vm2, %v329_v15  ;;  %v3402_v15 = vld [vmem:[%s4989_s1 + $0x20] sm:$0xf] }
  0x3f   : > { %3058 = vmatmul.msk.f32.gmra.mxu2 %vm377_vm2, %v349_v3  ;;  %v3885_v3 = vrot.slane %v3857_v34, 1  ;;  %3403 = vmatpush.msk.msra.mxu0 %vm442_vm0, %v3402_v15  ;;  %v3910_v15 = vld [vmem:[%s3575_s29 + $0xb8] sm:$0x3]  ;;  %v373_v34 = vrot.slane %v3916_v13, 1  ;;  %v740_v13 = vrot.slane %v3609_v18, 2 }
  0x40   : > { %3066 = vmatmul.msk.f32.gmra.mxu3 %vm377_vm2, %v369_v25  ;;  %v370_v25 = vrot.slane %v3860_v58, 1 }
  0x41   : > { %3042 = vmatmul.msk.f32.gmra.mxu0 %vm377_vm2, %v309_v0  ;;  %v3903_v58 = vsel %vm294_vm1, %v350_v42, %v3885_v3  ;;  %v3913_v0 = vld [vmem:[%s3575_s29 + $0x118] sm:$0x3]  ;;  %v333_v42 = vrot.slane %v3910_v15, 1 }
  0x42   : > { %5052 = vst [vmem:[#allocation20_spill] sm:$0xff] %v3903_v58  ;;  %v3907_v22 = vsel %vm294_vm1, %v370_v25, %v3889_v50  ;;  %v3928_v25 = vld [vmem:[%s3575_s29 + $0x58] sm:$0x3]  ;;  %v353_v12 = vrot.slane %v3913_v0, 1 }
  0x43   : > { %5053 = vst [vmem:[#allocation21_spill] sm:$0xff] %v3907_v22  ;;  %v313_v62 = vrot.slane %v3928_v25, 1  ;;  %v334_v55 = vsel %vm294_vm1, %v3872_v32, %v333_v42 }
  0x44   : > { %5054 = vst [vmem:[#allocation22_spill] sm:$0xff] %v3913_v0 }
  0x45   : > { %v314_v0 = vsel %vm294_vm1, %v3895_v26, %v313_v62 }
  0x46   : > { %3051 = vmatmul.msk.f32.gmra.mxu1 %vm377_vm2, %v3899_v40 }
  0x47   : > { %3059 = vmatmul.msk.f32.gmra.mxu2 %vm377_vm2, %v3903_v58  ;;  %v354_v58 = vsel %vm294_vm1, %v3885_v3, %v353_v12  ;;  %v742_v12 = vsel %vm739_vm3, %v740_v13, %v741_v60 }
  0x48   : > { %3067 = vmatmul.msk.f32.gmra.mxu3 %vm377_vm2, %v3907_v22  ;;  %v374_v22 = vsel %vm294_vm1, %v3889_v50, %v373_v34  ;;  %v3971_v34 = vrot.slane %v3682_v46, 2 }
  0x49   : > { %3043 = vmatmul.msk.f32.gmra.mxu0 %vm377_vm2, %v312_v27 }
  0x4e   : > { %3052 = vmatmul.msk.f32.gmra.mxu1 %vm377_vm2, %v334_v55 }
  0x4f   : > { %3060 = vmatmul.msk.f32.gmra.mxu2 %vm377_vm2, %v354_v58  ;;  %v3955_v58 = vld [vmem:[%s3575_s29 + $0x28] sm:$0x3] }
  0x50   : > { %3068 = vmatmul.msk.f32.gmra.mxu3 %vm377_vm2, %v374_v22  ;;  %v743_v22 = vrot.slane %v3640_v28, 2  ;;  %v1350_v62 = vrot.slane %v3955_v58, 1  ;;  %v1641_v28 = vrot.slane %v3679_v45, 2 }
  0x51   : > { %3044 = vmatmul.msk.f32.gmra.mxu0 %vm377_vm2, %v314_v0 }
  0x52   : > { %v744_v13 = vsel %vm739_vm3, %v741_v60, %v743_v22 }
  0x56   : > { %3070 = vmatmul.msk.f32.vlgmr.msrb.gmra.mxu1 %vm377_vm2, %v3609_v18  ;;  %v1351_v18 = vsel %vm294_vm1, %v3695_v52, %v1350_v62  ;;  %v748_v52 = vrot.slane %v3730_v61, 2  ;;  %v1646_v61 = vrot.slane %v3771_v30, 2 }
  0x57   : > { %3104 = vmatmul.msk.f32.vlgmr.msrb.gmra.mxu2 %vm377_vm2, %v742_v12 }
  0x58   : > { %3186 = vmatmul.msk.f32.vlgmr.msrb.gmra.mxu3 %vm377_vm2, %v3679_v45  ;;  %v749_v0 = vsel %vm739_vm3, %v3971_v34, %v748_v52  ;;  %v763_v52 = vrot.slane %v3606_v17, 2 }
  0x59   : > { %3220 = vmatmul.msk.f32.vlgmr.msrb.gmra.mxu0 %vm377_vm2, %v3722_v59  ;;  %v3976_v59 = vsel %vm739_vm3, %v1641_v28, %v3971_v34  ;;  %v3150_v28 = vld [vmem:[%s3575_s29 + $0x88] sm:$0x3] }
  0x5e   : > { %3071 = vmatmul.msk.f32.gmra.mxu1 %vm377_vm2, %v3619_v21  ;;  %v3985_v21 = vld [vmem:[%s3575_s29 + $0x40] sm:$0x3] }
  0x5f   : > { %3105 = vmatmul.msk.f32.gmra.mxu2 %vm377_vm2, %v744_v13  ;;  %v1355_v60 = vrot.slane %v3985_v21, 1 }
  0x60   : > { %3187 = vmatmul.msk.f32.gmra.mxu3 %vm377_vm2, %v3682_v46 }
  0x61   : > { %3221 = vmatmul.msk.f32.gmra.mxu0 %vm377_vm2, %v1351_v18 }
  0x66   : > { %3072 = vmatmul.msk.f32.gmra.mxu1 %vm377_vm2, %v3679_v45  ;;  %v1356_v45 = vsel %vm294_vm1, %v3787_v43, %v1355_v60  ;;  %v753_v43 = vrot.slane %v3822_v2, 2  ;;  %v1651_v2 = vrot.slane %v3875_v35, 2 }
  0x67   : > { %3106 = vmatmul.msk.f32.gmra.mxu2 %vm377_vm2, %v3976_v59 }
  0x68   : > { %3188 = vmatmul.msk.f32.gmra.mxu3 %vm377_vm2, %v3771_v30 }
  0x69   : > { %3222 = vmatmul.msk.f32.gmra.mxu0 %vm377_vm2, %v3815_v1  ;;  %v4002_v1 = vrot.slane %v3774_v31, 2 }
  0x6b   : > { %v4007_v42 = vsel %vm739_vm3, %v1646_v61, %v4002_v1  ;;  %v754_v12 = vsel %vm739_vm3, %v4002_v1, %v753_v43 }
  0x6e   : > { %3073 = vmatmul.msk.f32.gmra.mxu1 %vm377_vm2, %v3682_v46  ;;  %v4016_v46 = vld [vmem:[%s3575_s29 + $0x58] sm:$0x3] }
  0x6f   : > { %3107 = vmatmul.msk.f32.gmra.mxu2 %vm377_vm2, %v749_v0  ;;  %v1360_v55 = vrot.slane %v4016_v46, 1 }
  0x70   : > { %3189 = vmatmul.msk.f32.gmra.mxu3 %vm377_vm2, %v3774_v31 }
  0x71   : > { %3223 = vmatmul.msk.f32.gmra.mxu0 %vm377_vm2, %v1356_v45  ;;  %v1370_v45 = vrot.slane %v3150_v28, 1 }
  0x73   : > { %v1371_v17 = vsel %vm294_vm1, %v3676_v44, %v1370_v45  ;;  %v4147_v45 = vrot.slane %v3747_v8, 2 }
  0x75   : > { %5060 = vst [vmem:[#allocation28_spill] sm:$0xff] %v4147_v45 }
  0x76   : > { %3074 = vmatmul.msk.f32.gmra.mxu1 %vm377_vm2, %v3771_v30  ;;  %v1361_v30 = vsel %vm294_vm1, %v3895_v26, %v1360_v55  ;;  %v4046_v26 = vld [vmem:[%s3575_s29 + $0x70] sm:$0x3]  ;;  %v4103_v55 = vrot.slane %v3656_v37, 2 }
  0x77   : > { %3108 = vmatmul.msk.f32.gmra.mxu2 %vm377_vm2, %v4007_v42  ;;  %v1365_v62 = vrot.slane %v4046_v26, 1 }
  0x78   : > { %3190 = vmatmul.msk.f32.gmra.mxu3 %vm377_vm2, %v3875_v35  ;;  %5057 = vst [vmem:[#allocation25_spill] sm:$0xff] %v4103_v55 }
  0x79   : > { %3224 = vmatmul.msk.f32.gmra.mxu0 %vm377_vm2, %v312_v27  ;;  %v4032_v27 = vrot.slane %v3878_v41, 2 }
  0x7b   : > { %v4037_v22 = vsel %vm739_vm3, %v1651_v2, %v4032_v27 }
  0x7e   : > { %3075 = vmatmul.msk.f32.gmra.mxu1 %vm377_vm2, %v3774_v31  ;;  %v758_v31 = vrot.slane %v3928_v25, 2  ;;  %v1656_v25 = vrot.slane %v3578_v5, 2 }
  0x7f   : > { %3109 = vmatmul.msk.f32.gmra.mxu2 %vm377_vm2, %v754_v12 }
  0x80   : > { %3191 = vmatmul.msk.f32.gmra.mxu3 %vm377_vm2, %v3878_v41  ;;  %v759_v13 = vsel %vm739_vm3, %v4032_v27, %v758_v31  ;;  %v3153_v31 = vld [vmem:[%s3575_s29 + $0xa0] sm:$0x3] }
  0x81   : > { %3225 = vmatmul.msk.f32.gmra.mxu0 %vm377_vm2, %v1361_v30 }
  0x86   : > { %3076 = vmatmul.msk.f32.gmra.mxu1 %vm377_vm2, %v3875_v35  ;;  %v1366_v35 = vsel %vm294_vm1, %v3588_v9, %v1365_v62  ;;  %v768_v62 = vrot.slane %v3710_v56, 2 }
  0x87   : > { %3110 = vmatmul.msk.f32.gmra.mxu2 %vm377_vm2, %v4037_v22 }
  0x88   : > { %3192 = vmatmul.msk.f32.gmra.mxu3 %vm377_vm2, %v3578_v5  ;;  %v769_v28 = vsel %vm739_vm3, %v4103_v55, %v768_v62  ;;  %v773_v62 = vrot.slane %v3794_v49, 2 }
  0x89   : > { %3226 = vmatmul.msk.f32.gmra.mxu0 %vm377_vm2, %v3613_v19  ;;  %v4063_v19 = vrot.slane %v3581_v6, 2 }
  0x8b   : > { %v764_v61 = vsel %vm739_vm3, %v4063_v19, %v763_v52 }
  0x8e   : > { %3077 = vmatmul.msk.f32.gmra.mxu1 %vm377_vm2, %v3878_v41  ;;  %v4070_v41 = vsel %vm739_vm3, %v1656_v25, %v4063_v19  ;;  %v1375_v25 = vrot.slane %v3153_v31, 1  ;;  %v3156_v31 = vld [vmem:[%s3575_s29 + $0xb8] sm:$0x3] }
  0x8f   : > { %3111 = vmatmul.msk.f32.gmra.mxu2 %vm377_vm2, %v759_v13 }
  0x90   : > { %3193 = vmatmul.msk.f32.gmra.mxu3 %vm377_vm2, %v3581_v6  ;;  %v1376_v56 = vsel %vm294_vm1, %v3768_v29, %v1375_v25 }
  0x91   : > { %3227 = vmatmul.msk.f32.gmra.mxu0 %vm377_vm2, %v1366_v35 }
  0x93   : > { %v4066_v18 = vpop.f32.mrf.mxu1 }
  0x96   : > { %3078 = vmatmul.msk.f32.gmra.mxu1 %vm377_vm2, %v3578_v5  ;;  %v4074_v9 = vpop.f32.mrf.mxu0 }
  0x97   : > { %3112 = vmatmul.msk.f32.gmra.mxu2 %vm377_vm2, %v4070_v41 }
  0x98   : > { %3194 = vmatmul.msk.f32.gmra.mxu3 %vm377_vm2, %v3653_v36 }
  0x99   : > { %3228 = vmatmul.msk.f32.gmra.mxu0 %vm377_vm2, %v3699_v53  ;;  %v1661_v53 = vrot.slane %v3653_v36, 2 }
  0x9a   : > { %v4084_v60 = vpop.f32.mrf.mxu2 }
  0x9b   : > { %v4086_v0 = vpop.f32.mrf.mxu3  ;;  %v4088_v5 = vpop.f32.mrf.mxu1  ;;  %v4114_v44 = vsel %vm739_vm3, %v1661_v53, %v4103_v55 }
  0x9c   : > { %5056 = vst [vmem:[#allocation24_spill] sm:$0xff] %v4086_v0 }
  0x9e   : > { %3079 = vmatmul.msk.f32.gmra.mxu1 %vm377_vm2, %v3581_v6  ;;  %v4094_v43 = vpop.f32.mrf.mxu0 }
  0x9f   : > { %3113 = vmatmul.msk.f32.gmra.mxu2 %vm377_vm2, %v764_v61 }
  0xa0   : > { %3195 = vmatmul.msk.f32.gmra.mxu3 %vm377_vm2, %v3656_v37 }
  0xa1   : > { %3229 = vmatmul.msk.f32.gmra.mxu0 %vm377_vm2, %v1371_v17 }
  0xa2   : > { %v4106_v12 = vpop.f32.mrf.mxu2 }
  0xa3   : > { %v4108_v6 = vpop.f32.mrf.mxu3  ;;  %v4110_v30 = vpop.f32.mrf.mxu1 }
  0xa4   : > { %5058 = vst [vmem:[#allocation26_spill] sm:$0xff] %v4108_v6 }
  0xa6   : > { %3080 = vmatmul.msk.f32.gmra.mxu1 %vm377_vm2, %v3653_v36  ;;  %v4118_v2 = vpop.f32.mrf.mxu0 }
  0xa7   : > { %3114 = vmatmul.msk.f32.gmra.mxu2 %vm377_vm2, %v4114_v44 }
  0xa8   : > { %3196 = vmatmul.msk.f32.gmra.mxu3 %vm377_vm2, %v3744_v4 }
  0xa9   : > { %3230 = vmatmul.msk.f32.gmra.mxu0 %vm377_vm2, %v3791_v47  ;;  %v1666_v47 = vrot.slane %v3744_v4, 2 }
  0xaa   : > { %v4128_v13 = vpop.f32.mrf.mxu2 }
  0xab   : > { %v4130_v35 = vpop.f32.mrf.mxu3  ;;  %v4132_v36 = vpop.f32.mrf.mxu1  ;;  %v4158_v29 = vsel %vm739_vm3, %v1666_v47, %v4147_v45  ;;  %v774_v47 = vsel %vm739_vm3, %v4147_v45, %v773_v62 }
  0xac   : > { %5059 = vst [vmem:[#allocation27_spill] sm:$0xff] %v4130_v35 }
  0xad   : > { %5062 = vst [vmem:[#allocation30_spill] sm:$0xff] %v4158_v29 }
  0xae   : > { %3081 = vmatmul.msk.f32.gmra.mxu1 %vm377_vm2, %v3656_v37  ;;  %v4138_v52 = vpop.f32.mrf.mxu0 }
  0xaf   : > { %3115 = vmatmul.msk.f32.gmra.mxu2 %vm377_vm2, %v769_v28 }
  0xb0   : > { %3197 = vmatmul.msk.f32.gmra.mxu3 %vm377_vm2, %v3747_v8 }
  0xb1   : > { %3231 = vmatmul.msk.f32.gmra.mxu0 %vm377_vm2, %v1376_v56  ;;  %v1380_v56 = vrot.slane %v3156_v31, 1  ;;  %v4191_v31 = vrot.slane %v3851_v24, 2 }
  0xb2   : > { %v4150_v61 = vpop.f32.mrf.mxu2 }
  0xb3   : > { %v4152_v37 = vpop.f32.mrf.mxu3  ;;  %v4154_v17 = vpop.f32.mrf.mxu1  ;;  %v1381_v49 = vsel %vm294_vm1, %v3872_v32, %v1380_v56  ;;  %5064 = vst [vmem:[#allocation32_spill] sm:$0xff] %v4191_v31 }
  0xb4   : > { %5061 = vst [vmem:[#allocation29_spill] sm:$0xff] %v4152_v37 }
  0xb6   : > { %3082 = vmatmul.msk.f32.gmra.mxu1 %vm377_vm2, %v3744_v4  ;;  %v4162_v53 = vpop.f32.mrf.mxu0 }
  0xb7   : > { %3116 = vmatmul.msk.f32.gmra.mxu2 %vm377_vm2, %v4158_v29 }
  0xb8   : > { %3198 = vmatmul.msk.f32.gmra.mxu3 %vm377_vm2, %v3848_v63 }
  0xb9   : > { %3232 = vmatmul.msk.f32.gmra.mxu0 %vm377_vm2, %v3899_v40  ;;  %v1671_v40 = vrot.slane %v3848_v63, 2 }
  0xba   : > { %v4172_v25 = vpop.f32.mrf.mxu2 }
  0xbb   : > { %v4174_v28 = vpop.f32.mrf.mxu3  ;;  %v4176_v4 = vpop.f32.mrf.mxu1  ;;  %v4202_v32 = vsel %vm739_vm3, %v1671_v40, %v4191_v31 }
  0xbc   : > { %5063 = vst [vmem:[#allocation31_spill] sm:$0xff] %v4174_v28 }
  0xbd   : > { %5066 = vst [vmem:[#allocation34_spill] sm:$0xff] %v4202_v32 }
  0xbe   : > { %3083 = vmatmul.msk.f32.gmra.mxu1 %vm377_vm2, %v3747_v8  ;;  %v4182_v37 = vpop.f32.mrf.mxu0 }
  0xbf   : > { %3117 = vmatmul.msk.f32.gmra.mxu2 %vm377_vm2, %v774_v47  ;;  %v3159_v47 = vld [vmem:[%s3575_s29 + $0xd0] sm:$0x3] }
  0xc0   : > { %3199 = vmatmul.msk.f32.gmra.mxu3 %vm377_vm2, %v3851_v24  ;;  %v1385_v45 = vrot.slane %v3159_v47, 1  ;;  %v4235_v47 = vrot.slane %v3591_v10, 2 }
  0xc1   : > { %3233 = vmatmul.msk.f32.gmra.mxu0 %vm377_vm2, %v1381_v49  ;;  %v778_v49 = vrot.slane %v3910_v15, 2 }
  0xc2   : > { %v4194_v62 = vpop.f32.mrf.mxu2  ;;  %v1386_v15 = vsel %vm294_vm1, %v3601_v14, %v1385_v45  ;;  %v3162_v45 = vld [vmem:[%s3575_s29 + $0xe8] sm:$0x3] }
  0xc3   : > { %v4196_v8 = vpop.f32.mrf.mxu3  ;;  %v4198_v28 = vpop.f32.mrf.mxu1  ;;  %v779_v35 = vsel %vm739_vm3, %v4191_v31, %v778_v49  ;;  %v1390_v29 = vrot.slane %v3162_v45, 1  ;;  %v788_v45 = vrot.slane %v3713_v57, 2 }
  0xc4   : > { %5065 = vst [vmem:[#allocation33_spill] sm:$0xff] %v4196_v8 }
  0xc6   : > { %3084 = vmatmul.msk.f32.gmra.mxu1 %vm377_vm2, %v3848_v63  ;;  %v4206_v56 = vpop.f32.mrf.mxu0 }
  0xc7   : > { %3118 = vmatmul.msk.f32.gmra.mxu2 %vm377_vm2, %v4202_v32 }
  0xc8   : > { %3200 = vmatmul.msk.f32.gmra.mxu3 %vm377_vm2, %v3584_v7 }
  0xc9   : > { %3234 = vmatmul.msk.f32.gmra.mxu0 %vm377_vm2, %v3626_v23  ;;  %v1676_v23 = vrot.slane %v3584_v7, 2 }
  0xca   : > { %v4216_v8 = vpop.f32.mrf.mxu2 }
  0xcb   : > { %v4218_v40 = vpop.f32.mrf.mxu3  ;;  %v4220_v63 = vpop.f32.mrf.mxu1  ;;  %v4244_v14 = vsel %vm739_vm3, %v1676_v23, %v4235_v47 }
  0xcc   : > { %5067 = vst [vmem:[#allocation35_spill] sm:$0xff] %v4218_v40 }
  0xcd   : > { %5069 = vst [vmem:[#allocation37_spill] sm:$0xff] %v4244_v14 }
  0xce   : > { %3085 = vmatmul.msk.f32.gmra.mxu1 %vm377_vm2, %v3851_v24  ;;  %v4226_v32 = vpop.f32.mrf.mxu0 }
  0xcf   : > { %3119 = vmatmul.msk.f32.gmra.mxu2 %vm377_vm2, %v779_v35 }
  0xd0   : > { %3201 = vmatmul.msk.f32.gmra.mxu3 %vm377_vm2, %v3591_v10 }
  0xd1   : > { %3235 = vmatmul.msk.f32.gmra.mxu0 %vm377_vm2, %v1386_v15  ;;  %v783_v15 = vrot.slane %v3616_v20, 2  ;;  %v1391_v20 = vsel %vm294_vm1, %v3686_v48, %v1390_v29 }
  0xd2   : > { %v4238_v49 = vpop.f32.mrf.mxu2 }
  0xd3   : > { %v4240_v24 = vpop.f32.mrf.mxu3  ;;  %v643_v40 = vpop.f32.mrf.mxu1  ;;  %v784_v55 = vsel %vm739_vm3, %v4235_v47, %v783_v15 }
  0xd4   : > { %5068 = vst [vmem:[#allocation36_spill] sm:$0xff] %v4240_v24  ;;  %v644_v24 = vadd.f32 %v643_v40, %v4074_v9  ;;  %v4270_v40 = vrot.slane %v3662_v39, 2 }
  0xd6   : > { %3086 = vmatmul.msk.f32.gmra.mxu1 %vm377_vm2, %v3584_v7  ;;  %v1513_v35 = vpop.f32.mrf.mxu0 }
  0xd7   : > { %3120 = vmatmul.msk.f32.gmra.mxu2 %vm377_vm2, %v4244_v14 }
  0xd8   : > { %3202 = vmatmul.msk.f32.gmra.mxu3 %vm377_vm2, %v3659_v38 }
  0xd9   : > { %3236 = vmatmul.msk.f32.gmra.mxu0 %vm377_vm2, %v3703_v54  ;;  %v1681_v54 = vrot.slane %v3659_v38, 2 }
  0xda   : > { %v906_v23 = vpop.f32.mrf.mxu2 }
  0xdb   : > { %v1203_v31 = vpop.f32.mrf.mxu3  ;;  %v1002_v6 = vadd.f32 %v906_v23, %v644_v24  ;;  %v646_v7 = vpop.f32.mrf.mxu1 }
  0xdd   : > { %v1299_v14 = vadd.f32 %v1203_v31, %v1002_v6  ;;  %v647_v6 = vadd.f32 %v646_v7, %v4094_v43  ;;  %v3165_v43 = vld [vmem:[%s3575_s29 + $0x100] sm:$0x3] }
  0xde   : > { %3087 = vmatmul.msk.f32.gmra.mxu1 %vm377_vm2, %v3591_v10  ;;  %v1516_v0 = vpop.f32.mrf.mxu0 }
  0xdf   : > { %v4263_v9 = vadd.f32 %v1513_v35, %v1299_v14  ;;  %3121 = vmatmul.msk.f32.gmra.mxu2 %vm377_vm2, %v784_v55  ;;  %v4276_v55 = vsel %vm739_vm3, %v1681_v54, %v4270_v40  ;;  %v789_v54 = vsel %vm739_vm3, %v4270_v40, %v788_v45 }
  0xe0   : > { %3203 = vmatmul.msk.f32.gmra.mxu3 %vm377_vm2, %v3662_v39 }
  0xe1   : > { %3237 = vmatmul.msk.f32.gmra.mxu0 %vm377_vm2, %v1391_v20 }
  0xe2   : > { %v909_v10 = vpop.f32.mrf.mxu2 }
  0xe3   : > { %v1206_v31 = vpop.f32.mrf.mxu3  ;;  %v1003_v48 = vadd.f32 %v909_v10, %v647_v6  ;;  %v649_v29 = vpop.f32.mrf.mxu1 }
  0xe4   : > { %v650_v15 = vadd.f32 %v649_v29, %v4118_v2 }
  0xe5   : > { %v1300_v24 = vadd.f32 %v1206_v31, %v1003_v48  ;;  %v4304_v31 = vrot.slane %v3753_v16, 2 }
  0xe6   : > { %3088 = vmatmul.msk.f32.gmra.mxu1 %vm377_vm2, %v3659_v38  ;;  %v1519_v14 = vpop.f32.mrf.mxu0  ;;  %v1395_v38 = vrot.slane %v3165_v43, 1 }
  0xe7   : > { %v4280_v35 = vadd.f32 %v1516_v0, %v1300_v24  ;;  %3122 = vmatmul.msk.f32.gmra.mxu2 %vm377_vm2, %v4276_v55 }
  0xe8   : > { %3204 = vmatmul.msk.f32.gmra.mxu3 %vm377_vm2, %v3750_v11  ;;  %v1396_v57 = vsel %vm294_vm1, %v3778_v33, %v1395_v38 }
  0xe9   : > { %3238 = vmatmul.msk.f32.gmra.mxu0 %vm377_vm2, %v3798_v51  ;;  %v1686_v51 = vrot.slane %v3750_v11, 2 }
  0xea   : > { %v912_v23 = vpop.f32.mrf.mxu2 }
  0xeb   : > { %v1209_v7 = vpop.f32.mrf.mxu3  ;;  %v1004_v20 = vadd.f32 %v912_v23, %v650_v15  ;;  %v652_v0 = vpop.f32.mrf.mxu1  ;;  %v3168_v23 = vld [vmem:[%s3575_s29 + $0x118] sm:$0x3] }
  0xec   : > { %v653_v48 = vadd.f32 %v652_v0, %v4138_v52  ;;  %v5070_v52 = vld [vmem:[#allocation16_spill] sm:$0xff] }
  0xed   : > { %v1301_v6 = vadd.f32 %v1209_v7, %v1004_v20  ;;  %v5071_v7 = vld [vmem:[#allocation14_spill] sm:$0xff]  ;;  %v5072_v0 = vld [vmem:[#allocation20_spill] sm:$0xff] }
  0xee   : > { %3089 = vmatmul.msk.f32.gmra.mxu1 %vm377_vm2, %v3662_v39  ;;  %v1522_v10 = vpop.f32.mrf.mxu0  ;;  %v793_v38 = vrot.slane %v5071_v7, 2 }
  0xef   : > { %v4297_v2 = vadd.f32 %v1519_v14, %v1301_v6  ;;  %3123 = vmatmul.msk.f32.gmra.mxu2 %vm377_vm2, %v789_v54  ;;  %v4310_v14 = vsel %vm739_vm3, %v1686_v51, %v4304_v31  ;;  %v1400_v6 = vrot.slane %v3168_v23, 1 }
  0xf0   : > { %3205 = vmatmul.msk.f32.gmra.mxu3 %vm377_vm2, %v3753_v16  ;;  %v794_v51 = vsel %vm739_vm3, %v4304_v31, %v793_v38 }
  0xf1   : > { %3239 = vmatmul.msk.f32.gmra.mxu0 %vm377_vm2, %v1396_v57 }
  0xf2   : > { %v915_v39 = vpop.f32.mrf.mxu2 }
  0xf3   : > { %v1212_v29 = vpop.f32.mrf.mxu3  ;;  %v1005_v33 = vadd.f32 %v915_v39, %v653_v48  ;;  %v655_v24 = vpop.f32.mrf.mxu1 }
  0xf4   : > { %v656_v20 = vadd.f32 %v655_v24, %v4162_v53  ;;  %v3170_v24 = vld [vmem:[%s3575_s29 + $0x128] sm:$0xff] }
  0xf5   : > { %v1302_v43 = vadd.f32 %v1212_v29, %v1005_v33  ;;  %v1401_v29 = vsel %vm294_vm1, %v3885_v3, %v1400_v6  ;;  %v5073_v33 = vld [vmem:[#allocation17_spill] sm:$0xff]  ;;  %v5074_v6 = vld [vmem:[#allocation2_spill] sm:$0xff] }
  0xf6   : > { %3090 = vmatmul.msk.f32.gmra.mxu1 %vm377_vm2, %v3750_v11  ;;  %v1525_v45 = vpop.f32.mrf.mxu0  ;;  %v4339_v23 = vrot.slane %v5073_v33, 2 }
  0xf7   : > { %v4314_v15 = vadd.f32 %v1522_v10, %v1302_v43  ;;  %3124 = vmatmul.msk.f32.gmra.mxu2 %vm377_vm2, %v4310_v14  ;;  %v1691_v43 = vrot.slane %v5070_v52, 2 }
  0xf8   : > { %3206 = vmatmul.msk.f32.gmra.mxu3 %vm377_vm2, %v5070_v52 }
  0xf9   : > { %3240 = vmatmul.msk.f32.gmra.mxu0 %vm377_vm2, %v5072_v0  ;;  %v4345_v0 = vsel %vm739_vm3, %v1691_v43, %v4339_v23 }
  0xfa   : > { %v918_v54 = vpop.f32.mrf.mxu2 }
  0xfb   : > { %v1215_v11 = vpop.f32.mrf.mxu3  ;;  %v1006_v10 = vadd.f32 %v918_v54, %v656_v20  ;;  %v658_v57 = vpop.f32.mrf.mxu1 }
  0xfd   : > { %v1303_v48 = vadd.f32 %v1215_v11, %v1006_v10  ;;  %v5075_v10 = vrot.slane %v5074_v6, 1 }
  0xfe   : > { %3091 = vmatmul.msk.f32.gmra.mxu1 %vm377_vm2, %v3753_v16  ;;  %v1528_v39 = vpop.f32.mrf.mxu0  ;;  %v659_v16 = vadd.f32 %v658_v57, %v4182_v37 }
  0xff   : > { %v4331_v53 = vadd.f32 %v1525_v45, %v1303_v48  ;;  %3125 = vmatmul.msk.f32.gmra.mxu2 %vm377_vm2, %v794_v51  ;;  %v1403_v45 = vrot.slane %v3170_v24, 1  ;;  %v3171_v51 = vld [vmem:[%s3575_s29 + $0x130] sm:$0x3]  ;;  %v5077_v48 = vld [vmem:[#allocation22_spill] sm:$0xff] }
 0x100   : > { %3207 = vmatmul.msk.f32.gmra.mxu3 %vm377_vm2, %v5073_v33 }
 0x101   : > { %3241 = vmatmul.msk.f32.gmra.mxu0 %vm377_vm2, %v1401_v29  ;;  %v1404_v37 = vsel %vm294_vm1, %v5075_v10, %v1403_v45  ;;  %v798_v29 = vrot.slane %v5077_v48, 2 }
 0x102   : > { %v921_v7 = vpop.f32.mrf.mxu2 }
 0x103   : > { %v1218_v3 = vpop.f32.mrf.mxu3  ;;  %v1007_v38 = vadd.f32 %v921_v7, %v659_v16  ;;  %v661_v20 = vpop.f32.mrf.mxu1  ;;  %v1405_v7 = vrot.slane %v3171_v51, 1 }
 0x104   : > { %v662_v43 = vadd.f32 %v661_v20, %v4206_v56  ;;  %v5031_v56 = vrot.slane %v5074_v6, 2  ;;  %v5078_v20 = vld [vmem:[#allocation3_spill] sm:$0xff] }
 0x105   : > { %v1304_v54 = vadd.f32 %v1218_v3, %v1007_v38 }
 0x106   : > { %3092 = vmatmul.msk.f32.gmra.mxu1 %vm377_vm2, %v5070_v52  ;;  %v1531_v11 = vpop.f32.mrf.mxu0 }
 0x107   : > { %v4352_v57 = vadd.f32 %v1528_v39, %v1304_v54  ;;  %3126 = vmatmul.msk.f32.gmra.mxu2 %vm377_vm2, %v4345_v0  ;;  %v799_v39 = vsel %vm739_vm3, %v4339_v23, %v798_v29 }
 0x108   : > { %3208 = vmatmul.msk.f32.gmra.mxu3 %vm377_vm2, %v5074_v6 }
 0x109   : > { %5076 = vst [vmem:[#allocation16_spill] sm:$0xff] %v4352_v57  ;;  %3242 = vmatmul.msk.f32.gmra.mxu0 %vm377_vm2, %v1404_v37  ;;  %v1406_v57 = vsel %vm294_vm1, %v1403_v45, %v1405_v7  ;;  %v801_v37 = vrot.slane %v5078_v20, 2  ;;  %v5081_v7 = vld [vmem:[#allocation4_spill] sm:$0xff] }
 0x10a   : > { %v924_v52 = vpop.f32.mrf.mxu2 }
 0x10b   : > { %v1221_v16 = vpop.f32.mrf.mxu3  ;;  %v1008_v3 = vadd.f32 %v924_v52, %v662_v43  ;;  %v664_v38 = vpop.f32.mrf.mxu1  ;;  %v802_v45 = vsel %vm739_vm3, %v5031_v56, %v801_v37  ;;  %v5083_v56 = vld [vmem:[#allocation7_spill] sm:$0xff] }
 0x10c   : > { %v665_v51 = vadd.f32 %v664_v38, %v4226_v32  ;;  %v5080_v32 = vld [vmem:[#allocation5_spill] sm:$0xff] }
 0x10d   : > { %v1305_v54 = vadd.f32 %v1221_v16, %v1008_v3  ;;  %v803_v3 = vrot.slane %v5081_v7, 2 }
 0x10e   : > { %3093 = vmatmul.msk.f32.gmra.mxu1 %vm377_vm2, %v5073_v33  ;;  %v1534_v10 = vpop.f32.mrf.mxu0 }
 0x10f   : > { %v4367_v48 = vadd.f32 %v1531_v11, %v1305_v54  ;;  %3127 = vmatmul.msk.f32.gmra.mxu2 %vm377_vm2, %v799_v39  ;;  %v5082_v39 = vld [vmem:[#allocation8_spill] sm:$0xff] }
 0x110   : > { %3209 = vmatmul.msk.f32.gmra.mxu3 %vm377_vm2, %v3170_v24 }
 0x111   : > { %3243 = vmatmul.msk.f32.gmra.mxu0 %vm377_vm2, %v1406_v57  ;;  %v3174_v57 = vld [vmem:[%s3575_s29 + $0x148] sm:$0x3] }
 0x112   : > { %v927_v29 = vpop.f32.mrf.mxu2 }
 0x113   : > { %v1224_v33 = vpop.f32.mrf.mxu3  ;;  %v1009_v43 = vadd.f32 %v927_v29, %v665_v51  ;;  %v667_v52 = vpop.f32.mrf.mxu1  ;;  %v1410_v29 = vrot.slane %v3174_v57, 1 }
 0x114   : > { %v668_v38 = vadd.f32 %v667_v52, %v4066_v18  ;;  %v5084_v18 = vld [vmem:[#allocation6_spill] sm:$0xff]  ;;  %v1701_v52 = vrot.slane %v5080_v32, 2 }
 0x115   : > { %v1306_v11 = vadd.f32 %v1224_v33, %v1009_v43  ;;  %v1411_v7 = vsel %vm294_vm1, %v5083_v56, %v1410_v29  ;;  %v3177_v29 = vld [vmem:[%s3575_s29 + $0x160] sm:$0x3] }
 0x116   : > { %3094 = vmatmul.msk.f32.gmra.mxu1 %vm377_vm2, %v5074_v6  ;;  %v1537_v24 = vpop.f32.mrf.mxu0 }
 0x117   : > { %v4380_v16 = vadd.f32 %v1534_v10, %v1306_v11  ;;  %3128 = vmatmul.msk.f32.gmra.mxu2 %vm377_vm2, %v802_v45  ;;  %v804_v10 = vsel %vm739_vm3, %v801_v37, %v803_v3  ;;  %v4402_v37 = vrot.slane %v5084_v18, 2 }
 0x118   : > { %3210 = vmatmul.msk.f32.gmra.mxu3 %vm377_vm2, %v5080_v32 }
 0x119   : > { %5079 = vst [vmem:[#allocation14_spill] sm:$0xff] %v4380_v16  ;;  %3244 = vmatmul.msk.f32.gmra.mxu0 %vm377_vm2, %v5082_v39 }
 0x11a   : > { %v930_v54 = vpop.f32.mrf.mxu2 }
 0x11b   : > { %v1227_v51 = vpop.f32.mrf.mxu3  ;;  %v1010_v33 = vadd.f32 %v930_v54, %v668_v38  ;;  %v670_v43 = vpop.f32.mrf.mxu1  ;;  %v4408_v38 = vsel %vm739_vm3, %v1701_v52, %v4402_v37 }
 0x11c   : > { %v671_v57 = vadd.f32 %v670_v43, %v4088_v5  ;;  %v5085_v5 = vld [vmem:[#allocation10_spill] sm:$0xff] }
 0x11d   : > { %v1307_v11 = vadd.f32 %v1227_v51, %v1010_v33  ;;  %v5086_v33 = vld [vmem:[#allocation9_spill] sm:$0xff] }
 0x11e   : > { %3095 = vmatmul.msk.f32.gmra.mxu1 %vm377_vm2, %v5078_v20  ;;  %v1540_v45 = vpop.f32.mrf.mxu0  ;;  %v808_v43 = vrot.slane %v5086_v33, 2 }
 0x11f   : > { %v4395_v16 = vadd.f32 %v1537_v24, %v1307_v11  ;;  %3129 = vmatmul.msk.f32.gmra.mxu2 %vm377_vm2, %v804_v10  ;;  %v5087_v11 = vld [vmem:[#allocation13_spill] sm:$0xff] }
 0x120   : > { %3211 = vmatmul.msk.f32.gmra.mxu3 %vm377_vm2, %v5084_v18 }
 0x121   : > { %3245 = vmatmul.msk.f32.gmra.mxu0 %vm377_vm2, %v1411_v7 }
 0x122   : > { %v933_v20 = vpop.f32.mrf.mxu2 }
 0x123   : > { %v1230_v3 = vpop.f32.mrf.mxu3  ;;  %v1011_v56 = vadd.f32 %v933_v20, %v671_v57  ;;  %v673_v24 = vpop.f32.mrf.mxu1  ;;  %v809_v20 = vsel %vm739_vm3, %v4402_v37, %v808_v43 }
 0x124   : > { %v674_v10 = vadd.f32 %v673_v24, %v4110_v30  ;;  %v5089_v24 = vld [vmem:[#allocation11_spill] sm:$0xff] }
 0x125   : > { %v1308_v39 = vadd.f32 %v1230_v3, %v1011_v56  ;;  %v4436_v43 = vrot.slane %v5089_v24, 2 }
 0x126   : > { %3096 = vmatmul.msk.f32.gmra.mxu1 %vm377_vm2, %v5080_v32  ;;  %v1543_v54 = vpop.f32.mrf.mxu0  ;;  %v1415_v32 = vrot.slane %v3177_v29, 1  ;;  %v1706_v29 = vrot.slane %v5085_v5, 2 }
 0x127   : > { %v4412_v51 = vadd.f32 %v1540_v45, %v1308_v39  ;;  %3130 = vmatmul.msk.f32.gmra.mxu2 %vm377_vm2, %v4408_v38  ;;  %v5088_v39 = vld [vmem:[#allocation12_spill] sm:$0xff]  ;;  %5090 = vst [vmem:[#allocation20_spill] sm:$0xff] %v4436_v43 }
 0x128   : > { %3212 = vmatmul.msk.f32.gmra.mxu3 %vm377_vm2, %v5085_v5  ;;  %v1416_v33 = vsel %vm294_vm1, %v5088_v39, %v1415_v32 }
 0x129   : > { %3246 = vmatmul.msk.f32.gmra.mxu0 %vm377_vm2, %v5087_v11 }
 0x12a   : > { %v936_v7 = vpop.f32.mrf.mxu2 }
 0x12b   : > { %v1233_v52 = vpop.f32.mrf.mxu3  ;;  %v1012_v57 = vadd.f32 %v936_v7, %v674_v10  ;;  %v676_v45 = vpop.f32.mrf.mxu1 }
 0x12c   : > { %v677_v10 = vadd.f32 %v676_v45, %v4132_v36  ;;  %v5092_v36 = vld [vmem:[#allocation18_spill] sm:$0xff]  ;;  %v3180_v45 = vld [vmem:[%s3575_s29 + $0x178] sm:$0x3] }
 0x12d   : > { %v1309_v3 = vadd.f32 %v1233_v52, %v1012_v57  ;;  %v4442_v52 = vsel %vm739_vm3, %v1706_v29, %v4436_v43  ;;  %v5094_v29 = vld [vmem:[#allocation21_spill] sm:$0xff] }
 0x12e   : > { %3097 = vmatmul.msk.f32.gmra.mxu1 %vm377_vm2, %v5084_v18  ;;  %v1546_v56 = vpop.f32.mrf.mxu0 }
 0x12f   : > { %v4429_v30 = vadd.f32 %v1543_v54, %v1309_v3  ;;  %3131 = vmatmul.msk.f32.gmra.mxu2 %vm377_vm2, %v809_v20  ;;  %v5093_v3 = vld [vmem:[#allocation15_spill] sm:$0xff] }
 0x130   : > { %3213 = vmatmul.msk.f32.gmra.mxu3 %vm377_vm2, %v5089_v24  ;;  %v813_v39 = vrot.slane %v5093_v3, 2 }
 0x131   : > { %3247 = vmatmul.msk.f32.gmra.mxu0 %vm377_vm2, %v1416_v33 }
 0x132   : > { %v939_v18 = vpop.f32.mrf.mxu2 }
 0x133   : > { %v1236_v11 = vpop.f32.mrf.mxu3  ;;  %v1013_v7 = vadd.f32 %v939_v18, %v677_v10  ;;  %v679_v54 = vpop.f32.mrf.mxu1 }
 0x134   : > { %v680_v33 = vadd.f32 %v679_v54, %v4154_v17 }
 0x135   : > { %v1310_v32 = vadd.f32 %v1236_v11, %v1013_v7  ;;  %v814_v7 = vsel %vm739_vm3, %v4436_v43, %v813_v39 }
 0x136   : > { %3098 = vmatmul.msk.f32.gmra.mxu1 %vm377_vm2, %v5085_v5  ;;  %v1549_v57 = vpop.f32.mrf.mxu0 }
 0x137   : > { %v4446_v20 = vadd.f32 %v1546_v56, %v1310_v32  ;;  %3132 = vmatmul.msk.f32.gmra.mxu2 %vm377_vm2, %v4442_v52  ;;  %v1420_v56 = vrot.slane %v3180_v45, 1  ;;  %v3182_v45 = vld [vmem:[%s3575_s29 + $0x188] sm:$0xff] }
 0x138   : > { %3214 = vmatmul.msk.f32.gmra.mxu3 %vm377_vm2, %v5092_v36 }
 0x139   : > { %5091 = vst [vmem:[#allocation17_spill] sm:$0xff] %v4446_v20  ;;  %3248 = vmatmul.msk.f32.gmra.mxu0 %vm377_vm2, %v5094_v29  ;;  %v1421_v17 = vsel %vm294_vm1, %v3889_v50, %v1420_v56  ;;  %v5096_v29 = vld [vmem:[#allocation19_spill] sm:$0xff]  ;;  %v1423_v56 = vrot.slane %v3182_v45, 1 }
 0x13a   : > { %v942_v10 = vpop.f32.mrf.mxu2  ;;  %v4471_v39 = vrot.slane %v5096_v29, 2 }
 0x13b   : > { %v1239_v5 = vpop.f32.mrf.mxu3  ;;  %v1014_v18 = vadd.f32 %v942_v10, %v680_v33  ;;  %v682_v11 = vpop.f32.mrf.mxu1  ;;  %v1711_v33 = vrot.slane %v5092_v36, 2 }
 0x13c   : > { %v683_v10 = vadd.f32 %v682_v11, %v4176_v4 }
 0x13d   : > { %v1311_v32 = vadd.f32 %v1239_v5, %v1014_v18 }
 0x13e   : > { %3099 = vmatmul.msk.f32.gmra.mxu1 %vm377_vm2, %v5089_v24  ;;  %v1552_v3 = vpop.f32.mrf.mxu0  ;;  %v3181_v24 = vld [vmem:[%s3575_s29 + $0x180] sm:$0xff] }
 0x13f   : > { %v4463_v54 = vadd.f32 %v1549_v57, %v1311_v32  ;;  %3133 = vmatmul.msk.f32.gmra.mxu2 %vm377_vm2, %v814_v7  ;;  %v1422_v5 = vrot.slane %v3181_v24, 1  ;;  %v4478_v32 = vsel %vm739_vm3, %v1711_v33, %v4471_v39 }
 0x140   : > { %3215 = vmatmul.msk.f32.gmra.mxu3 %vm377_vm2, %v5096_v29  ;;  %5097 = vst [vmem:[#allocation22_spill] sm:$0xff] %v4478_v32 }
 0x141   : > { %5095 = vst [vmem:[#allocation2_spill] sm:$0xff] %v4463_v54  ;;  %3249 = vmatmul.msk.f32.gmra.mxu0 %vm377_vm2, %v1421_v17  ;;  %v1424_v4 = vsel %vm294_vm1, %v1422_v5, %v1423_v56  ;;  %v3183_v17 = vld [vmem:[%s3575_s29 + $0x190] sm:$0x3] }
 0x142   : > { %v945_v50 = vpop.f32.mrf.mxu2 }
 0x143   : > { %v1242_v57 = vpop.f32.mrf.mxu3  ;;  %v1015_v18 = vadd.f32 %v945_v50, %v683_v10  ;;  %v685_v7 = vpop.f32.mrf.mxu1  ;;  %v5099_v10 = vld [vmem:[#allocation23_spill] sm:$0xff] }
 0x144   : > { %v818_v33 = vrot.slane %v5099_v10, 2  ;;  %v686_v50 = vadd.f32 %v685_v7, %v4198_v28 }
 0x145   : > { %v1312_v54 = vadd.f32 %v1242_v57, %v1015_v18  ;;  %v1425_v18 = vrot.slane %v3183_v17, 1 }
 0x146   : > { %3100 = vmatmul.msk.f32.gmra.mxu1 %vm377_vm2, %v5092_v36  ;;  %v1555_v20 = vpop.f32.mrf.mxu0 }
 0x147   : > { %v4483_v11 = vadd.f32 %v1552_v3, %v1312_v54  ;;  %3134 = vmatmul.msk.f32.gmra.mxu2 %vm377_vm2, %v4478_v32  ;;  %v819_v3 = vsel %vm739_vm3, %v4471_v39, %v818_v33  ;;  %v3287_v32 = vld [vmem:[%s3575_s29 + $0x38] sm:$0xff]  ;;  %v1426_v10 = vsel %vm294_vm1, %v1423_v56, %v1425_v18  ;;  %v3288_v18 = vld [vmem:[%s3575_s29 + $0x40] sm:$0x3] }
 0x148   : > { %3216 = vmatmul.msk.f32.gmra.mxu3 %vm377_vm2, %v3181_v24 }
 0x149   : > { %5098 = vst [vmem:[#allocation3_spill] sm:$0xff] %v4483_v11  ;;  %3250 = vmatmul.msk.f32.gmra.mxu0 %vm377_vm2, %v1424_v4  ;;  %v3286_v11 = vld [vmem:[%s3575_s29 + $0x30] sm:$0xff]  ;;  %v2249_v4 = vrot.slane %v3287_v32, 1 }
 0x14a   : > { %v948_v36 = vpop.f32.mrf.mxu2  ;;  %v2248_v7 = vrot.slane %v3286_v11, 1 }
 0x14b   : > { %v1245_v57 = vpop.f32.mrf.mxu3  ;;  %v1016_v43 = vadd.f32 %v948_v36, %v686_v50  ;;  %v688_v5 = vpop.f32.mrf.mxu1  ;;  %v2542_v50 = vrot.slane %v3286_v11, 2 }
 0x14c   : > { %v689_v17 = vadd.f32 %v688_v5, %v4220_v63  ;;  %v2250_v56 = vsel %vm294_vm1, %v2248_v7, %v2249_v4  ;;  %v1644_v5 = vrot.slane %v3955_v58, 2 }
 0x14d   : > { %v1313_v54 = vadd.f32 %v1245_v57, %v1016_v43 }
 0x14e   : > { %3101 = vmatmul.msk.f32.gmra.mxu1 %vm377_vm2, %v5096_v29  ;;  %v1558_v24 = vpop.f32.mrf.mxu0  ;;  %v2543_v29 = vrot.slane %v3287_v32, 2 }
 0x14f   : > { %v4499_v28 = vadd.f32 %v1555_v20, %v1313_v54  ;;  %3135 = vmatmul.msk.f32.gmra.mxu2 %vm377_vm2, %v819_v3  ;;  %v2251_v54 = vrot.slane %v3288_v18, 1 }
 0x150   : > { %3217 = vmatmul.msk.f32.gmra.mxu3 %vm377_vm2, %v3182_v45  ;;  %v2544_v3 = vsel %vm739_vm3, %v2542_v50, %v2543_v29 }
 0x151   : > { %3251 = vmatmul.msk.f32.gmra.mxu0 %vm377_vm2, %v1426_v10  ;;  %v2252_v50 = vsel %vm294_vm1, %v2249_v4, %v2251_v54 }
 0x152   : > { %v951_v43 = vpop.f32.mrf.mxu2 }
 0x153   : > { %v1248_v33 = vpop.f32.mrf.mxu3  ;;  %v1017_v36 = vadd.f32 %v951_v43, %v689_v17  ;;  %v691_v57 = vpop.f32.mrf.mxu1  ;;  %v2545_v17 = vrot.slane %v3288_v18, 2 }
 0x154   : > { %v692_v10 = vadd.f32 %v691_v57, %v4084_v60 }
 0x155   : > { %v1314_v20 = vadd.f32 %v1248_v33, %v1017_v36  ;;  %v3289_v36 = vld [vmem:[%s3575_s29 + $0x48] sm:$0xff]  ;;  %v2546_v60 = vsel %vm739_vm3, %v2543_v29, %v2545_v17 }
 0x156   : > { %3254 = vmatmul.msk.f32.vlgmr.msra.gmra.mxu1 %vm377_vm2, %v3976_v59  ;;  %v1561_v45 = vpop.f32.mrf.mxu0 }
 0x157   : > { %v4510_v63 = vadd.f32 %v1558_v24, %v1314_v20  ;;  %3336 = vmatmul.msk.f32.vlgmr.msra.gmra.mxu2 %vm377_vm2, %v3286_v11  ;;  %v1645_v24 = vsel %vm739_vm3, %v3971_v34, %v1644_v5  ;;  %v2253_v20 = vrot.slane %v3289_v36, 1  ;;  %v2547_v5 = vrot.slane %v3289_v36, 2 }
 0x158   : > { %3370 = vmatmul.msk.f32.vlgmr.msra.gmra.mxu3 %vm377_vm2, %v2250_v56  ;;  %v3290_v56 = vld [vmem:[%s3575_s29 + $0x50] sm:$0xff] }
 0x159   : > { %3404 = vmatmul.msk.f32.vlgmr.msra.gmra.mxu0 %vm377_vm2, %v2544_v3  ;;  %v2254_v18 = vrot.slane %v3290_v56, 1  ;;  %v2548_v54 = vrot.slane %v3290_v56, 2 }
 0x15a   : > { %v954_v7 = vpop.f32.mrf.mxu2 }
 0x15b   : > { %v1251_v59 = vpop.f32.mrf.mxu3  ;;  %v1018_v43 = vadd.f32 %v954_v7, %v692_v10  ;;  %v694_v33 = vpop.f32.mrf.mxu1  ;;  %v2255_v29 = vsel %vm294_vm1, %v2253_v20, %v2254_v18  ;;  %v2549_v17 = vsel %vm739_vm3, %v2547_v5, %v2548_v54 }
 0x15c   : > { %v695_v34 = vadd.f32 %v694_v33, %v4106_v12 }
 0x15d   : > { %v1315_v11 = vadd.f32 %v1251_v59, %v1018_v43  ;;  %v3291_v59 = vld [vmem:[%s3575_s29 + $0x58] sm:$0x3]  ;;  %v1649_v43 = vrot.slane %v3985_v21, 2 }
 0x15e   : > { %3255 = vmatmul.msk.f32.gmra.mxu1 %vm377_vm2, %v1645_v24  ;;  %v1564_v58 = vpop.f32.mrf.mxu0  ;;  %v2256_v33 = vrot.slane %v3291_v59, 1 }
 0x15f   : > { %v4524_v57 = vadd.f32 %v1561_v45, %v1315_v11  ;;  %3337 = vmatmul.msk.f32.gmra.mxu2 %vm377_vm2, %v3287_v32  ;;  %v2550_v11 = vrot.slane %v3291_v59, 2 }
 0x160   : > { %3371 = vmatmul.msk.f32.gmra.mxu3 %vm377_vm2, %v2252_v50 }
 0x161   : > { %3405 = vmatmul.msk.f32.gmra.mxu0 %vm377_vm2, %v2546_v60 }
 0x162   : > { %v957_v4 = vpop.f32.mrf.mxu2 }
 0x163   : > { %v1254_v3 = vpop.f32.mrf.mxu3  ;;  %v1019_v10 = vadd.f32 %v957_v4, %v695_v34  ;;  %v697_v7 = vpop.f32.mrf.mxu1  ;;  %v2257_v34 = vsel %vm294_vm1, %v2254_v18, %v2256_v33  ;;  %v3292_v4 = vld [vmem:[%s3575_s29 + $0x60] sm:$0xff]  ;;  %v3294_v33 = vld [vmem:[%s3575_s29 + $0x70] sm:$0x3] }
 0x164   : > { %v698_v24 = vadd.f32 %v697_v7, %v4128_v13  ;;  %v2551_v13 = vsel %vm739_vm3, %v2548_v54, %v2550_v11 }
 0x165   : > { %v1316_v45 = vadd.f32 %v1254_v3, %v1019_v10  ;;  %v3293_v3 = vld [vmem:[%s3575_s29 + $0x68] sm:$0xff]  ;;  %v2258_v10 = vrot.slane %v3292_v4, 1 }
 0x166   : > { %3256 = vmatmul.msk.f32.gmra.mxu1 %vm377_vm2, %v4007_v42  ;;  %v1567_v32 = vpop.f32.mrf.mxu0  ;;  %v2259_v7 = vrot.slane %v3293_v3, 1  ;;  %v2553_v59 = vrot.slane %v3293_v3, 2 }
 0x167   : > { %v4535_v12 = vadd.f32 %v1564_v58, %v1316_v45  ;;  %3338 = vmatmul.msk.f32.gmra.mxu2 %vm377_vm2, %v3289_v36  ;;  %v1650_v58 = vsel %vm739_vm3, %v4002_v1, %v1649_v43  ;;  %v2552_v45 = vrot.slane %v3292_v4, 2 }
 0x168   : > { %3372 = vmatmul.msk.f32.gmra.mxu3 %vm377_vm2, %v2255_v29  ;;  %v2260_v54 = vsel %vm294_vm1, %v2258_v10, %v2259_v7  ;;  %v3296_v10 = vld [vmem:[%s3575_s29 + $0x80] sm:$0xff] }
 0x169   : > { %3406 = vmatmul.msk.f32.gmra.mxu0 %vm377_vm2, %v2549_v17 }
 0x16a   : > { %v960_v50 = vpop.f32.mrf.mxu2 }
 0x16b   : > { %v1257_v42 = vpop.f32.mrf.mxu3  ;;  %v1020_v60 = vadd.f32 %v960_v50, %v698_v24  ;;  %v700_v20 = vpop.f32.mrf.mxu1  ;;  %v2554_v24 = vsel %vm739_vm3, %v2552_v45, %v2553_v59  ;;  %v1654_v50 = vrot.slane %v4016_v46, 2 }
 0x16c   : > { %v701_v1 = vadd.f32 %v700_v20, %v4150_v61  ;;  %v2555_v20 = vrot.slane %v3294_v33, 2 }
 0x16d   : > { %v1317_v36 = vadd.f32 %v1257_v42, %v1020_v60  ;;  %v2261_v42 = vrot.slane %v3294_v33, 1 }
 0x16e   : > { %3257 = vmatmul.msk.f32.gmra.mxu1 %vm377_vm2, %v1650_v58  ;;  %v1570_v21 = vpop.f32.mrf.mxu0 }
 0x16f   : > { %v4549_v5 = vadd.f32 %v1567_v32, %v1317_v36  ;;  %3339 = vmatmul.msk.f32.gmra.mxu2 %vm377_vm2, %v3290_v56  ;;  %v1655_v36 = vsel %vm739_vm3, %v4032_v27, %v1654_v50  ;;  %v1659_v50 = vrot.slane %v4046_v26, 2 }
 0x170   : > { %3373 = vmatmul.msk.f32.gmra.mxu3 %vm377_vm2, %v2257_v34 }
 0x171   : > { %3407 = vmatmul.msk.f32.gmra.mxu0 %vm377_vm2, %v2551_v13  ;;  %v3295_v13 = vld [vmem:[%s3575_s29 + $0x78] sm:$0xff] }
 0x172   : > { %v963_v18 = vpop.f32.mrf.mxu2 }
 0x173   : > { %v1260_v29 = vpop.f32.mrf.mxu3  ;;  %v1021_v17 = vadd.f32 %v963_v18, %v701_v1  ;;  %v703_v43 = vpop.f32.mrf.mxu1  ;;  %v2263_v18 = vrot.slane %v3295_v13, 1 }
 0x174   : > { %v704_v11 = vadd.f32 %v703_v43, %v4172_v25  ;;  %v2556_v25 = vsel %vm739_vm3, %v2553_v59, %v2555_v20  ;;  %v2558_v43 = vrot.slane %v3296_v10, 2 }
 0x175   : > { %v1318_v32 = vadd.f32 %v1260_v29, %v1021_v17  ;;  %v2264_v29 = vrot.slane %v3296_v10, 1  ;;  %v2557_v17 = vrot.slane %v3295_v13, 2 }
 0x176   : > { %3258 = vmatmul.msk.f32.gmra.mxu1 %vm377_vm2, %v4037_v22  ;;  %v1573_v56 = vpop.f32.mrf.mxu0 }
 0x177   : > { %v4560_v61 = vadd.f32 %v1570_v21, %v1318_v32  ;;  %3340 = vmatmul.msk.f32.gmra.mxu2 %vm377_vm2, %v3292_v4  ;;  %v2262_v21 = vsel %vm294_vm1, %v2259_v7, %v2261_v42  ;;  %v2265_v59 = vsel %vm294_vm1, %v2263_v18, %v2264_v29 }
 0x178   : > { %3374 = vmatmul.msk.f32.gmra.mxu3 %vm377_vm2, %v2260_v54 }
 0x179   : > { %3408 = vmatmul.msk.f32.gmra.mxu0 %vm377_vm2, %v2554_v24  ;;  %v2559_v24 = vsel %vm739_vm3, %v2557_v17, %v2558_v43 }
 0x17a   : > { %v966_v60 = vpop.f32.mrf.mxu2 }
 0x17b   : > { %v1263_v22 = vpop.f32.mrf.mxu3  ;;  %v1022_v58 = vadd.f32 %v966_v60, %v704_v11  ;;  %v706_v34 = vpop.f32.mrf.mxu1 }
 0x17c   : > { %v707_v27 = vadd.f32 %v706_v34, %v4194_v62  ;;  %v1660_v34 = vsel %vm739_vm3, %v4063_v19, %v1659_v50  ;;  %v5100_v50 = vld [vmem:[#allocation24_spill] sm:$0xff] }
 0x17d   : > { %v1319_v4 = vadd.f32 %v1263_v22, %v1022_v58 }
 0x17e   : > { %3259 = vmatmul.msk.f32.gmra.mxu1 %vm377_vm2, %v1655_v36  ;;  %v1576_v46 = vpop.f32.mrf.mxu0 }
 0x17f   : > { %v4574_v1 = vadd.f32 %v1573_v56, %v1319_v4  ;;  %3341 = vmatmul.msk.f32.gmra.mxu2 %vm377_vm2, %v3293_v3  ;;  %v3297_v56 = vld [vmem:[%s3575_s29 + $0x88] sm:$0x3]  ;;  %v3298_v4 = vld [vmem:[%s3575_s29 + $0x90] sm:$0xff] }
 0x180   : > { %3375 = vmatmul.msk.f32.gmra.mxu3 %vm377_vm2, %v2262_v21  ;;  %v2266_v42 = vrot.slane %v3297_v56, 1  ;;  %v2560_v22 = vrot.slane %v3297_v56, 2  ;;  %v3468_v56 = vld [vmem:[%s3575_s29 + $0x88] sm:$0x3] }
 0x181   : > { %3409 = vmatmul.msk.f32.gmra.mxu0 %vm377_vm2, %v2556_v25  ;;  %v2268_v25 = vrot.slane %v3298_v4, 1 }
 0x182   : > { %v969_v7 = vpop.f32.mrf.mxu2  ;;  %v2267_v36 = vsel %vm294_vm1, %v2264_v29, %v2266_v42 }
 0x183   : > { %v1266_v45 = vpop.f32.mrf.mxu3  ;;  %v1023_v54 = vadd.f32 %v969_v7, %v707_v27  ;;  %v709_v32 = vpop.f32.mrf.mxu1  ;;  %v2562_v7 = vrot.slane %v3298_v4, 2 }
 0x184   : > { %v710_v11 = vadd.f32 %v709_v32, %v4216_v8  ;;  %v2561_v8 = vsel %vm739_vm3, %v2558_v43, %v2560_v22 }
 0x185   : > { %v1320_v33 = vadd.f32 %v1266_v45, %v1023_v54 }
 0x186   : > { %3260 = vmatmul.msk.f32.gmra.mxu1 %vm377_vm2, %v4070_v41  ;;  %v1579_v3 = vpop.f32.mrf.mxu0 }
 0x187   : > { %v4585_v62 = vadd.f32 %v1576_v46, %v1320_v33  ;;  %3342 = vmatmul.msk.f32.gmra.mxu2 %vm377_vm2, %v3295_v13  ;;  %v3299_v13 = vld [vmem:[%s3575_s29 + $0x98] sm:$0xff] }
 0x188   : > { %3376 = vmatmul.msk.f32.gmra.mxu3 %vm377_vm2, %v2265_v59  ;;  %v2269_v18 = vrot.slane %v3299_v13, 1  ;;  %v2563_v45 = vrot.slane %v3299_v13, 2  ;;  %v3300_v59 = vld [vmem:[%s3575_s29 + $0xa0] sm:$0x3] }
 0x189   : > { %3410 = vmatmul.msk.f32.gmra.mxu0 %vm377_vm2, %v2559_v24  ;;  %v2271_v24 = vrot.slane %v3300_v59, 1 }
 0x18a   : > { %v972_v60 = vpop.f32.mrf.mxu2  ;;  %v2270_v54 = vsel %vm294_vm1, %v2268_v25, %v2269_v18  ;;  %v2564_v33 = vsel %vm739_vm3, %v2562_v7, %v2563_v45 }
 0x18b   : > { %v1269_v41 = vpop.f32.mrf.mxu3  ;;  %v1024_v20 = vadd.f32 %v972_v60, %v710_v11  ;;  %v712_v58 = vpop.f32.mrf.mxu1  ;;  %v2565_v60 = vrot.slane %v3300_v59, 2 }
 0x18c   : > { %v713_v19 = vadd.f32 %v712_v58, %v4238_v49 }
 0x18d   : > { %v1321_v21 = vadd.f32 %v1269_v41, %v1024_v20  ;;  %v5101_v20 = vld [vmem:[#allocation25_spill] sm:$0xff] }
 0x18e   : > { %3261 = vmatmul.msk.f32.gmra.mxu1 %vm377_vm2, %v1660_v34  ;;  %v1582_v26 = vpop.f32.mrf.mxu0  ;;  %v2272_v34 = vsel %vm294_vm1, %v2269_v18, %v2271_v24 }
 0x18f   : > { %v4599_v46 = vadd.f32 %v1579_v3, %v1321_v21  ;;  %3343 = vmatmul.msk.f32.gmra.mxu2 %vm377_vm2, %v3296_v10  ;;  %v1664_v3 = vrot.slane %v3468_v56, 2  ;;  %v3301_v21 = vld [vmem:[%s3575_s29 + $0xa8] sm:$0xff] }
 0x190   : > { %3377 = vmatmul.msk.f32.gmra.mxu3 %vm377_vm2, %v2267_v36 }
 0x191   : > { %3411 = vmatmul.msk.f32.gmra.mxu0 %vm377_vm2, %v2561_v8  ;;  %v1665_v58 = vsel %vm739_vm3, %v5101_v20, %v1664_v3  ;;  %v2566_v8 = vsel %vm739_vm3, %v2563_v45, %v2565_v60 }
 0x192   : > { %v975_v29 = vpop.f32.mrf.mxu2 }
 0x193   : > { %v1272_v27 = vpop.f32.mrf.mxu3  ;;  %v1025_v17 = vadd.f32 %v975_v29, %v713_v19  ;;  %v715_v43 = vpop.f32.mrf.mxu1  ;;  %v2273_v19 = vrot.slane %v3301_v21, 1 }
 0x194   : > { %v716_v42 = vadd.f32 %v715_v43, %v5100_v50  ;;  %v2567_v43 = vrot.slane %v3301_v21, 2  ;;  %v3469_v50 = vld [vmem:[%s3575_s29 + $0xa0] sm:$0x3] }
 0x195   : > { %v1322_v32 = vadd.f32 %v1272_v27, %v1025_v17  ;;  %v5102_v27 = vld [vmem:[#allocation26_spill] sm:$0xff] }
 0x196   : > { %3262 = vmatmul.msk.f32.gmra.mxu1 %vm377_vm2, %v4114_v44  ;;  %v1585_v10 = vpop.f32.mrf.mxu0 }
 0x197   : > { %v4610_v49 = vadd.f32 %v1582_v26, %v1322_v32  ;;  %3344 = vmatmul.msk.f32.gmra.mxu2 %vm377_vm2, %v3298_v4  ;;  %v3302_v4 = vld [vmem:[%s3575_s29 + $0xb0] sm:$0xff] }
 0x198   : > { %3378 = vmatmul.msk.f32.gmra.mxu3 %vm377_vm2, %v2270_v54  ;;  %v2274_v29 = vrot.slane %v3302_v4, 1  ;;  %v2568_v54 = vrot.slane %v3302_v4, 2 }
 0x199   : > { %3412 = vmatmul.msk.f32.gmra.mxu0 %vm377_vm2, %v2564_v33  ;;  %v3303_v33 = vld [vmem:[%s3575_s29 + $0xb8] sm:$0x3] }
 0x19a   : > { %v978_v11 = vpop.f32.mrf.mxu2  ;;  %v2275_v59 = vsel %vm294_vm1, %v2273_v19, %v2274_v29  ;;  %v2569_v3 = vsel %vm739_vm3, %v2567_v43, %v2568_v54  ;;  %v2570_v20 = vrot.slane %v3303_v33, 2  ;;  %v3304_v19 = vld [vmem:[%s3575_s29 + $0xc0] sm:$0xff] }
 0x19b   : > { %v1275_v44 = vpop.f32.mrf.mxu3  ;;  %v1026_v41 = vadd.f32 %v978_v11, %v716_v42  ;;  %v718_v22 = vpop.f32.mrf.mxu1  ;;  %v1669_v42 = vrot.slane %v3469_v50, 2  ;;  %v2276_v11 = vrot.slane %v3303_v33, 1  ;;  %v2278_v43 = vrot.slane %v3304_v19, 1 }
 0x19c   : > { %v719_v7 = vadd.f32 %v718_v22, %v5102_v27  ;;  %v3305_v27 = vld [vmem:[%s3575_s29 + $0xc8] sm:$0xff]  ;;  %v2572_v33 = vrot.slane %v3304_v19, 2 }
 0x19d   : > { %v1323_v36 = vadd.f32 %v1275_v44, %v1026_v41  ;;  %v5104_v44 = vld [vmem:[#allocation27_spill] sm:$0xff] }
 0x19e   : > { %3263 = vmatmul.msk.f32.gmra.mxu1 %vm377_vm2, %v1665_v58  ;;  %v1588_v26 = vpop.f32.mrf.mxu0 }
 0x19f   : > { %v4624_v25 = vadd.f32 %v1585_v10, %v1323_v36  ;;  %3345 = vmatmul.msk.f32.gmra.mxu2 %vm377_vm2, %v3299_v13  ;;  %v5103_v13 = vld [vmem:[#allocation30_spill] sm:$0xff]  ;;  %v5105_v36 = vld [vmem:[#allocation28_spill] sm:$0xff] }
 0x1a0   : > { %3379 = vmatmul.msk.f32.gmra.mxu3 %vm377_vm2, %v2272_v34 }
 0x1a1   : > { %3413 = vmatmul.msk.f32.gmra.mxu0 %vm377_vm2, %v2566_v8 }
 0x1a2   : > { %v981_v18 = vpop.f32.mrf.mxu2 }
 0x1a3   : > { %v1278_v17 = vpop.f32.mrf.mxu3  ;;  %v1027_v32 = vadd.f32 %v981_v18, %v719_v7  ;;  %v721_v45 = vpop.f32.mrf.mxu1  ;;  %v2571_v18 = vsel %vm739_vm3, %v2568_v54, %v2570_v20 }
 0x1a4   : > { %v722_v60 = vadd.f32 %v721_v45, %v5104_v44  ;;  %v5106_v45 = vld [vmem:[#allocation29_spill] sm:$0xff] }
 0x1a5   : > { %v1324_v10 = vadd.f32 %v1278_v17, %v1027_v32  ;;  %v2279_v32 = vrot.slane %v3305_v27, 1 }
 0x1a6   : > { %3264 = vmatmul.msk.f32.gmra.mxu1 %vm377_vm2, %v5103_v13  ;;  %v1591_v56 = vpop.f32.mrf.mxu0  ;;  %v2573_v13 = vrot.slane %v3305_v27, 2 }
 0x1a7   : > { %v4635_v24 = vadd.f32 %v1588_v26, %v1324_v10  ;;  %3346 = vmatmul.msk.f32.gmra.mxu2 %vm377_vm2, %v3301_v21  ;;  %v1670_v26 = vsel %vm739_vm3, %v5105_v36, %v1669_v42  ;;  %v2277_v21 = vsel %vm294_vm1, %v2274_v29, %v2276_v11  ;;  %v3306_v42 = vld [vmem:[%s3575_s29 + $0xd0] sm:$0x3] }
 0x1a8   : > { %3380 = vmatmul.msk.f32.gmra.mxu3 %vm377_vm2, %v2275_v59  ;;  %v2574_v44 = vsel %vm739_vm3, %v2572_v33, %v2573_v13  ;;  %v2281_v20 = vrot.slane %v3306_v42, 1 }
 0x1a9   : > { %3414 = vmatmul.msk.f32.gmra.mxu0 %vm377_vm2, %v2569_v3 }
 0x1aa   : > { %v984_v41 = vpop.f32.mrf.mxu2 }
 0x1ab   : > { %v1281_v22 = vpop.f32.mrf.mxu3  ;;  %v1028_v58 = vadd.f32 %v984_v41, %v722_v60  ;;  %v724_v34 = vpop.f32.mrf.mxu1  ;;  %v3470_v41 = vld [vmem:[%s3575_s29 + $0xb8] sm:$0x3] }
 0x1ac   : > { %v725_v59 = vadd.f32 %v724_v34, %v5106_v45 }
 0x1ad   : > { %v1325_v8 = vadd.f32 %v1281_v22, %v1028_v58  ;;  %v1674_v22 = vrot.slane %v3470_v41, 2  ;;  %v5108_v58 = vld [vmem:[#allocation31_spill] sm:$0xff] }
 0x1ae   : > { %3265 = vmatmul.msk.f32.gmra.mxu1 %vm377_vm2, %v1670_v26  ;;  %v1594_v7 = vpop.f32.mrf.mxu0 }
 0x1af   : > { %v4649_v17 = vadd.f32 %v1591_v56, %v1325_v8  ;;  %3347 = vmatmul.msk.f32.gmra.mxu2 %vm377_vm2, %v3302_v4  ;;  %v2280_v56 = vsel %vm294_vm1, %v2278_v43, %v2279_v32  ;;  %v5107_v4 = vld [vmem:[#allocation34_spill] sm:$0xff] }
 0x1b0   : > { %3381 = vmatmul.msk.f32.gmra.mxu3 %vm377_vm2, %v2277_v21  ;;  %v2575_v21 = vrot.slane %v3306_v42, 2 }
 0x1b1   : > { %3415 = vmatmul.msk.f32.gmra.mxu0 %vm377_vm2, %v2571_v18 }
 0x1b2   : > { %v987_v29 = vpop.f32.mrf.mxu2  ;;  %v2576_v33 = vsel %vm739_vm3, %v2573_v13, %v2575_v21  ;;  %v3471_v21 = vld [vmem:[%s3575_s29 + $0xd0] sm:$0x3] }
 0x1b3   : > { %v1284_v10 = vpop.f32.mrf.mxu3  ;;  %v1029_v3 = vadd.f32 %v987_v29, %v725_v59  ;;  %v727_v54 = vpop.f32.mrf.mxu1  ;;  %v3307_v59 = vld [vmem:[%s3575_s29 + $0xd8] sm:$0xff]  ;;  %v3308_v29 = vld [vmem:[%s3575_s29 + $0xe0] sm:$0xff] }
 0x1b4   : > { %v728_v34 = vadd.f32 %v727_v54, %v5108_v58  ;;  %v2283_v54 = vrot.slane %v3307_v59, 1  ;;  %v2578_v41 = vrot.slane %v3308_v29, 2  ;;  %v3309_v58 = vld [vmem:[%s3575_s29 + $0xe8] sm:$0x3] }
 0x1b5   : > { %v1326_v50 = vadd.f32 %v1284_v10, %v1029_v3 }
 0x1b6   : > { %3266 = vmatmul.msk.f32.gmra.mxu1 %vm377_vm2, %v5107_v4  ;;  %v1597_v11 = vpop.f32.mrf.mxu0 }
 0x1b7   : > { %v4660_v60 = vadd.f32 %v1594_v7, %v1326_v50  ;;  %3348 = vmatmul.msk.f32.gmra.mxu2 %vm377_vm2, %v3304_v19  ;;  %v5109_v7 = vld [vmem:[#allocation32_spill] sm:$0xff]  ;;  %v2282_v19 = vsel %vm294_vm1, %v2279_v32, %v2281_v20  ;;  %v5110_v50 = vld [vmem:[#allocation33_spill] sm:$0xff] }
 0x1b8   : > { %3382 = vmatmul.msk.f32.gmra.mxu3 %vm377_vm2, %v2280_v56  ;;  %v1675_v43 = vsel %vm739_vm3, %v5109_v7, %v1674_v22  ;;  %v2284_v56 = vrot.slane %v3308_v29, 1  ;;  %v5112_v7 = vld [vmem:[#allocation35_spill] sm:$0xff] }
 0x1b9   : > { %3416 = vmatmul.msk.f32.gmra.mxu0 %vm377_vm2, %v2574_v44  ;;  %v2577_v44 = vrot.slane %v3307_v59, 2 }
 0x1ba   : > { %v990_v36 = vpop.f32.mrf.mxu2 }
 0x1bb   : > { %v1287_v26 = vpop.f32.mrf.mxu3  ;;  %v1030_v8 = vadd.f32 %v990_v36, %v728_v34  ;;  %v730_v18 = vpop.f32.mrf.mxu1  ;;  %v2579_v36 = vsel %vm739_vm3, %v2577_v44, %v2578_v41 }
 0x1bc   : > { %v731_v42 = vadd.f32 %v730_v18, %v5110_v50  ;;  %v2286_v18 = vrot.slane %v3309_v58, 1 }
 0x1bd   : > { %v1327_v45 = vadd.f32 %v1287_v26, %v1030_v8  ;;  %v1679_v8 = vrot.slane %v3471_v21, 2 }
 0x1be   : > { %3267 = vmatmul.msk.f32.gmra.mxu1 %vm377_vm2, %v1675_v43  ;;  %v1600_v10 = vpop.f32.mrf.mxu0 }
 0x1bf   : > { %v4674_v3 = vadd.f32 %v1597_v11, %v1327_v45  ;;  %3349 = vmatmul.msk.f32.gmra.mxu2 %vm377_vm2, %v3305_v27  ;;  %v2285_v11 = vsel %vm294_vm1, %v2283_v54, %v2284_v56  ;;  %v5111_v27 = vld [vmem:[#allocation37_spill] sm:$0xff] }
 0x1c0   : > { %3383 = vmatmul.msk.f32.gmra.mxu3 %vm377_vm2, %v2282_v19 }
 0x1c1   : > { %3417 = vmatmul.msk.f32.gmra.mxu0 %vm377_vm2, %v2576_v33  ;;  %v2580_v33 = vrot.slane %v3309_v58, 2 }
 0x1c2   : > { %v993_v32 = vpop.f32.mrf.mxu2 }
 0x1c3   : > { %v1290_v4 = vpop.f32.mrf.mxu3  ;;  %v1031_v22 = vadd.f32 %v993_v32, %v731_v42  ;;  %v733_v13 = vpop.f32.mrf.mxu1  ;;  %v3310_v32 = vld [vmem:[%s3575_s29 + $0xf0] sm:$0xff] }
 0x1c4   : > { %v734_v43 = vadd.f32 %v733_v13, %v5112_v7  ;;  %v3312_v7 = vld [vmem:[%s3575_s29 + $0x100] sm:$0x3] }
 0x1c5   : > { %v1328_v20 = vadd.f32 %v1290_v4, %v1031_v22  ;;  %v3311_v4 = vld [vmem:[%s3575_s29 + $0xf8] sm:$0xff]  ;;  %v2581_v22 = vsel %vm739_vm3, %v2578_v41, %v2580_v33 }
 0x1c6   : > { %3268 = vmatmul.msk.f32.gmra.mxu1 %vm377_vm2, %v5111_v27  ;;  %v1603_v34 = vpop.f32.mrf.mxu0  ;;  %v2583_v21 = vrot.slane %v3311_v4, 2 }
 0x1c7   : > { %v4685_v26 = vadd.f32 %v1600_v10, %v1328_v20  ;;  %3350 = vmatmul.msk.f32.gmra.mxu2 %vm377_vm2, %v3307_v59  ;;  %v1680_v10 = vsel %vm739_vm3, %v4235_v47, %v1679_v8  ;;  %v2287_v59 = vsel %vm294_vm1, %v2284_v56, %v2286_v18  ;;  %v2289_v20 = vrot.slane %v3311_v4, 1  ;;  %v5113_v47 = vld [vmem:[#allocation36_spill] sm:$0xff] }
 0x1c8   : > { %3384 = vmatmul.msk.f32.gmra.mxu3 %vm377_vm2, %v2285_v11  ;;  %v2288_v11 = vrot.slane %v3310_v32, 1 }
 0x1c9   : > { %3418 = vmatmul.msk.f32.gmra.mxu0 %vm377_vm2, %v2579_v36  ;;  %v2582_v36 = vrot.slane %v3310_v32, 2 }
 0x1ca   : > { %v996_v19 = vpop.f32.mrf.mxu2 }
 0x1cb   : > { %v1293_v45 = vpop.f32.mrf.mxu3  ;;  %v1032_v54 = vadd.f32 %v996_v19, %v734_v43  ;;  %v736_v50 = vpop.f32.mrf.mxu1  ;;  %v2584_v43 = vsel %vm739_vm3, %v2582_v36, %v2583_v21 }
 0x1cc   : > { %v737_v58 = vadd.f32 %v736_v50, %v5113_v47  ;;  %v4723_v47 = vld [vmem:[%s4990_s2] ss:$0 sm:$0xff] }
 0x1cd   : > { %v1329_v42 = vadd.f32 %v1293_v45, %v1032_v54  ;;  %v3472_v45 = vld [vmem:[%s3575_s29 + $0xe8] sm:$0x3]  ;;  %v2291_v54 = vrot.slane %v3312_v7, 1 }
 0x1ce   : > { %3269 = vmatmul.msk.f32.gmra.mxu1 %vm377_vm2, %v1680_v10  ;;  %v1606_v44 = vpop.f32.mrf.mxu0  ;;  %v1684_v33 = vrot.slane %v3472_v45, 2 }
 0x1cf   : > { %v4699_v13 = vadd.f32 %v1603_v34, %v1329_v42  ;;  %3351 = vmatmul.msk.f32.gmra.mxu2 %vm377_vm2, %v3308_v29  ;;  %v2290_v34 = vsel %vm294_vm1, %v2288_v11, %v2289_v20 }
 0x1d0   : > { %3385 = vmatmul.msk.f32.gmra.mxu3 %vm377_vm2, %v2287_v59  ;;  %v2585_v59 = vrot.slane %v3312_v7, 2 }
 0x1d1   : > { %3419 = vmatmul.msk.f32.gmra.mxu0 %vm377_vm2, %v2581_v22  ;;  %v2292_v22 = vsel %vm294_vm1, %v2289_v20, %v2291_v54 }
 0x1d2   : > { %v999_v56 = vpop.f32.mrf.mxu2 }
 0x1d3   : > { %v1296_v27 = vpop.f32.mrf.mxu3  ;;  %v1033_v8 = vadd.f32 %v999_v56, %v737_v58  ;;  %v1807_v41 = vpop.f32.mrf.mxu1  ;;  %v3314_v58 = vld [vmem:[%s3575_s29 + $0x110] sm:$0xff] }
 0x1d4   : > { %v1903_v50 = vadd.f32 %v1807_v41, %v4263_v9  ;;  %v3313_v9 = vld [vmem:[%s3575_s29 + $0x108] sm:$0xff]  ;;  %v2294_v20 = vrot.slane %v3314_v58, 1 }
 0x1d5   : > { %v1330_v18 = vadd.f32 %v1296_v27, %v1033_v8  ;;  %v2586_v27 = vsel %vm739_vm3, %v2583_v21, %v2585_v59 }
 0x1d6   : > { %3270 = vmatmul.msk.f32.gmra.mxu1 %vm377_vm2, %v4276_v55  ;;  %v2708_v29 = vpop.f32.mrf.mxu0 }
 0x1d7   : > { %v4710_v19 = vadd.f32 %v1606_v44, %v1330_v18  ;;  %3352 = vmatmul.msk.f32.gmra.mxu2 %vm377_vm2, %v3310_v32  ;;  %v1685_v32 = vsel %vm739_vm3, %v4270_v40, %v1684_v33  ;;  %v2293_v40 = vrot.slane %v3313_v9, 1  ;;  %v2588_v18 = vrot.slane %v3314_v58, 2  ;;  %v3315_v33 = vld [vmem:[%s3575_s29 + $0x118] sm:$0x3] }
 0x1d8   : > { %3386 = vmatmul.msk.f32.gmra.mxu3 %vm377_vm2, %v2290_v34 }
 0x1d9   : > { %3420 = vmatmul.msk.f32.gmra.mxu0 %vm377_vm2, %v2584_v43 }
 0x1da   : > { %v2104_v55 = vpop.f32.mrf.mxu2 }
 0x1db   : > { %v2414_v10 = vpop.f32.mrf.mxu3  ;;  %v2200_v42 = vadd.f32 %v2104_v55, %v1903_v50  ;;  %v1810_v44 = vpop.f32.mrf.mxu1 }
 0x1dc   : > { %v1904_v8 = vadd.f32 %v1810_v44, %v4280_v35  ;;  %v2295_v35 = vsel %vm294_vm1, %v2293_v40, %v2294_v20 }
 0x1dd   : > { %v2510_v11 = vadd.f32 %v2414_v10, %v2200_v42  ;;  %v3473_v10 = vld [vmem:[%s3575_s29 + $0x100] sm:$0x3]  ;;  %v2296_v42 = vrot.slane %v3315_v33, 1 }
 0x1de   : > { %3271 = vmatmul.msk.f32.gmra.mxu1 %vm377_vm2, %v1685_v32  ;;  %v2711_v56 = vpop.f32.mrf.mxu0  ;;  %v1689_v59 = vrot.slane %v3473_v10, 2  ;;  %v3318_v10 = vld [vmem:[%s3575_s29 + $0x130] sm:$0x3] }
 0x1df   : > { %v2804_v36 = vadd.f32 %v2708_v29, %v2510_v11  ;;  %3353 = vmatmul.msk.f32.gmra.mxu2 %vm377_vm2, %v3311_v4  ;;  %v2587_v4 = vrot.slane %v3313_v9, 2  ;;  %v2590_v11 = vrot.slane %v3315_v33, 2  ;;  %v2297_v40 = vsel %vm294_vm1, %v2294_v20, %v2296_v42 }
 0x1e0   : > { %3387 = vmatmul.msk.f32.gmra.mxu3 %vm377_vm2, %v2292_v22 }
 0x1e1   : > { %v2840_v41 = vadd.f32 %v4723_v47, %v2804_v36  ;;  %3421 = vmatmul.msk.f32.gmra.mxu0 %vm377_vm2, %v2586_v27  ;;  %v2589_v50 = vsel %vm739_vm3, %v2587_v4, %v2588_v18  ;;  %v1690_v36 = vsel %vm739_vm3, %v4304_v31, %v1689_v59 }
 0x1e2   : > { %v2107_v21 = vpop.f32.mrf.mxu2 }
 0x1e3   : > { %v2417_v34 = vpop.f32.mrf.mxu3  ;;  %v2872_v7 = vmax.f32 %v2840_v41, 0.0  ;;  %v2201_v29 = vadd.f32 %v2107_v21, %v1904_v8  ;;  %v1813_v43 = vpop.f32.mrf.mxu1  ;;  %v3316_v41 = vld [vmem:[%s3575_s29 + $0x120] sm:$0xff]  ;;  %v3317_v21 = vld [vmem:[%s3575_s29 + $0x128] sm:$0xff] }
 0x1e4   : > { %v1905_v44 = vadd.f32 %v1813_v43, %v4297_v2  ;;  %v2299_v31 = vrot.slane %v3317_v21, 1 }
 0x1e5   : > { %2904 = vst [vmem:[%s4738_s20] sm:$0xff] %v2872_v7  ;;  %v2511_v45 = vadd.f32 %v2417_v34, %v2201_v29  ;;  %v2591_v34 = vsel %vm739_vm3, %v2588_v18, %v2590_v11  ;;  %v2298_v7 = vrot.slane %v3316_v41, 1  ;;  %v2593_v18 = vrot.slane %v3317_v21, 2 }
 0x1e6   : > { %3272 = vmatmul.msk.f32.gmra.mxu1 %vm377_vm2, %v4310_v14  ;;  %v2714_v54 = vpop.f32.mrf.mxu0 }
 0x1e7   : > { %v2805_v55 = vadd.f32 %v2711_v56, %v2511_v45  ;;  %3354 = vmatmul.msk.f32.gmra.mxu2 %vm377_vm2, %v3313_v9  ;;  %v2592_v45 = vrot.slane %v3316_v41, 2 }
 0x1e8   : > { %3388 = vmatmul.msk.f32.gmra.mxu3 %vm377_vm2, %v2295_v35 }
 0x1e9   : > { %v2841_v32 = vadd.f32 %v4723_v47, %v2805_v55  ;;  %3422 = vmatmul.msk.f32.gmra.mxu0 %vm377_vm2, %v2589_v50  ;;  %v2594_v59 = vsel %vm739_vm3, %v2592_v45, %v2593_v18 }
 0x1ea   : > { %v2110_v14 = vpop.f32.mrf.mxu2 }
 0x1eb   : > { %v2420_v22 = vpop.f32.mrf.mxu3  ;;  %v2873_v56 = vmax.f32 %v2841_v32, 0.0  ;;  %v2202_v27 = vadd.f32 %v2110_v14, %v1905_v44  ;;  %v1816_v9 = vpop.f32.mrf.mxu1  ;;  %v3474_v44 = vld [vmem:[%s3575_s29 + $0x118] sm:$0x3]  ;;  %v2301_v14 = vrot.slane %v3318_v10, 1 }
 0x1ec   : > { %v1906_v20 = vadd.f32 %v1816_v9, %v4314_v15  ;;  %v1694_v32 = vrot.slane %v3474_v44, 2 }
 0x1ed   : > { %2905 = vst [vmem:[%s4738_s20 + $0x8] sm:$0xff] %v2873_v56  ;;  %v2512_v8 = vadd.f32 %v2420_v22, %v2202_v27  ;;  %v2595_v27 = vrot.slane %v3318_v10, 2 }
 0x1ee   : > { %3273 = vmatmul.msk.f32.gmra.mxu1 %vm377_vm2, %v1690_v36  ;;  %v2717_v2 = vpop.f32.mrf.mxu0 }
 0x1ef   : > { %v2806_v4 = vadd.f32 %v2714_v54, %v2512_v8  ;;  %3355 = vmatmul.msk.f32.gmra.mxu2 %vm377_vm2, %v3314_v58  ;;  %v2300_v58 = vsel %vm294_vm1, %v2298_v7, %v2299_v31  ;;  %v1695_v8 = vsel %vm739_vm3, %v4339_v23, %v1694_v32  ;;  %v2596_v7 = vsel %vm739_vm3, %v2593_v18, %v2595_v27  ;;  %v3321_v32 = vld [vmem:[%s3575_s29 + $0x148] sm:$0x3] }
 0x1f0   : > { %3389 = vmatmul.msk.f32.gmra.mxu3 %vm377_vm2, %v2297_v40 }
 0x1f1   : > { %v2842_v29 = vadd.f32 %v4723_v47, %v2806_v4  ;;  %3423 = vmatmul.msk.f32.gmra.mxu0 %vm377_vm2, %v2591_v34  ;;  %v3319_v34 = vld [vmem:[%s3575_s29 + $0x138] sm:$0xff] }
 0x1f2   : > { %v2113_v43 = vpop.f32.mrf.mxu2  ;;  %v2303_v23 = vrot.slane %v3319_v34, 1  ;;  %v2597_v18 = vrot.slane %v3319_v34, 2 }
 0x1f3   : > { %v2423_v35 = vpop.f32.mrf.mxu3  ;;  %v2874_v33 = vmax.f32 %v2842_v29, 0.0  ;;  %v2203_v54 = vadd.f32 %v2113_v43, %v1906_v20  ;;  %v1819_v50 = vpop.f32.mrf.mxu1  ;;  %v3475_v20 = vld [vmem:[%s3575_s29 + $0x128] sm:$0xff] }
 0x1f4   : > { %v1907_v22 = vadd.f32 %v1819_v50, %v4331_v53  ;;  %v3320_v53 = vld [vmem:[%s3575_s29 + $0x140] sm:$0xff]  ;;  %v1697_v29 = vrot.slane %v3475_v20, 2 }
 0x1f5   : > { %2906 = vst [vmem:[%s4738_s20 + $0x10] sm:$0xff] %v2874_v33  ;;  %v2513_v55 = vadd.f32 %v2423_v35, %v2203_v54  ;;  %v5114_v35 = vld [vmem:[#allocation16_spill] sm:$0xff] }
 0x1f6   : > { %3274 = vmatmul.msk.f32.gmra.mxu1 %vm377_vm2, %v4345_v0  ;;  %v2720_v15 = vpop.f32.mrf.mxu0 }
 0x1f7   : > { %v2807_v42 = vadd.f32 %v2717_v2, %v2513_v55  ;;  %3356 = vmatmul.msk.f32.gmra.mxu2 %vm377_vm2, %v3316_v41  ;;  %v2302_v41 = vsel %vm294_vm1, %v2299_v31, %v2301_v14  ;;  %v2304_v31 = vrot.slane %v3320_v53, 1 }
 0x1f8   : > { %3390 = vmatmul.msk.f32.gmra.mxu3 %vm377_vm2, %v2300_v58  ;;  %v2598_v58 = vrot.slane %v3320_v53, 2 }
 0x1f9   : > { %v2843_v11 = vadd.f32 %v4723_v47, %v2807_v42  ;;  %3424 = vmatmul.msk.f32.gmra.mxu0 %vm377_vm2, %v2594_v59  ;;  %v2305_v42 = vsel %vm294_vm1, %v2303_v23, %v2304_v31  ;;  %v3323_v23 = vld [vmem:[%s3575_s29 + $0x158] sm:$0xff] }
 0x1fa   : > { %v2116_v0 = vpop.f32.mrf.mxu2 }
 0x1fb   : > { %v2426_v56 = vpop.f32.mrf.mxu3  ;;  %v2875_v9 = vmax.f32 %v2843_v11, 0.0  ;;  %v2204_v36 = vadd.f32 %v2116_v0, %v1907_v22  ;;  %v1822_v40 = vpop.f32.mrf.mxu1  ;;  %v2599_v22 = vsel %vm739_vm3, %v2597_v18, %v2598_v58  ;;  %v3476_v0 = vld [vmem:[%s3575_s29 + $0x130] sm:$0x3] }
 0x1fc   : > { %v1908_v45 = vadd.f32 %v1822_v40, %v5114_v35 }
 0x1fd   : > { %2907 = vst [vmem:[%s4738_s20 + $0x18] sm:$0xff] %v2875_v9  ;;  %v2514_v2 = vadd.f32 %v2426_v56, %v2204_v36  ;;  %v2306_v56 = vrot.slane %v3321_v32, 1 }
 0x1fe   : > { %3275 = vmatmul.msk.f32.gmra.mxu1 %vm377_vm2, %v1695_v8  ;;  %v2723_v4 = vpop.f32.mrf.mxu0  ;;  %v2600_v8 = vrot.slane %v3321_v32, 2 }
 0x1ff   : > { %v2808_v43 = vadd.f32 %v2720_v15, %v2514_v2  ;;  %3357 = vmatmul.msk.f32.gmra.mxu2 %vm377_vm2, %v3317_v21  ;;  %v5115_v15 = vrot.slane %v5074_v6, 2  ;;  %v1699_v6 = vrot.slane %v3476_v0, 2 }
 0x200   : > { %3391 = vmatmul.msk.f32.gmra.mxu3 %vm377_vm2, %v2302_v41  ;;  %v2601_v35 = vsel %vm739_vm3, %v2598_v58, %v2600_v8  ;;  %v2603_v58 = vrot.slane %v3323_v23, 2 }
 0x201   : > { %v2844_v33 = vadd.f32 %v4723_v47, %v2808_v43  ;;  %3425 = vmatmul.msk.f32.gmra.mxu0 %vm377_vm2, %v2596_v7  ;;  %v1698_v59 = vsel %vm739_vm3, %v5115_v15, %v1697_v29  ;;  %v2307_v7 = vsel %vm294_vm1, %v2304_v31, %v2306_v56  ;;  %v3322_v43 = vld [vmem:[%s3575_s29 + $0x150] sm:$0xff] }
 0x202   : > { %v2119_v54 = vpop.f32.mrf.mxu2 }
 0x203   : > { %v2429_v50 = vpop.f32.mrf.mxu3  ;;  %v2876_v55 = vmax.f32 %v2844_v33, 0.0  ;;  %v2205_v10 = vadd.f32 %v2119_v54, %v1908_v45  ;;  %v1825_v21 = vpop.f32.mrf.mxu1  ;;  %v2308_v33 = vrot.slane %v3322_v43, 1  ;;  %v5116_v54 = vld [vmem:[#allocation14_spill] sm:$0xff] }
 0x204   : > { %v1909_v27 = vadd.f32 %v1825_v21, %v4367_v48 }
 0x205   : > { %2908 = vst [vmem:[%s4738_s20 + $0x20] sm:$0xff] %v2876_v55  ;;  %v2515_v44 = vadd.f32 %v2429_v50, %v2205_v10  ;;  %v2602_v10 = vrot.slane %v3322_v43, 2 }
 0x206   : > { %3276 = vmatmul.msk.f32.gmra.mxu1 %vm377_vm2, %v1698_v59  ;;  %v2726_v14 = vpop.f32.mrf.mxu0 }
 0x207   : > { %v2809_v11 = vadd.f32 %v2723_v4, %v2515_v44  ;;  %3358 = vmatmul.msk.f32.gmra.mxu2 %vm377_vm2, %v3319_v34  ;;  %v1700_v4 = vsel %vm739_vm3, %v1697_v29, %v1699_v6  ;;  %v2309_v29 = vrot.slane %v3323_v23, 1  ;;  %v3324_v44 = vld [vmem:[%s3575_s29 + $0x160] sm:$0x3] }
 0x208   : > { %3392 = vmatmul.msk.f32.gmra.mxu3 %vm377_vm2, %v2305_v42  ;;  %v2311_v6 = vrot.slane %v3324_v44, 1 }
 0x209   : > { %v2845_v9 = vadd.f32 %v4723_v47, %v2809_v11  ;;  %3426 = vmatmul.msk.f32.gmra.mxu0 %vm377_vm2, %v2599_v22  ;;  %v3477_v11 = vld [vmem:[%s3575_s29 + $0x148] sm:$0x3] }
 0x20a   : > { %v2122_v36 = vpop.f32.mrf.mxu2  ;;  %v1704_v0 = vrot.slane %v3477_v11, 2 }
 0x20b   : > { %v2432_v40 = vpop.f32.mrf.mxu3  ;;  %v2877_v41 = vmax.f32 %v2845_v9, 0.0  ;;  %v2206_v2 = vadd.f32 %v2122_v36, %v1909_v27  ;;  %v1828_v34 = vpop.f32.mrf.mxu1  ;;  %v2605_v36 = vrot.slane %v3324_v44, 2 }
 0x20c   : > { %v1910_v31 = vadd.f32 %v1828_v34, %v5116_v54  ;;  %v2312_v34 = vsel %vm294_vm1, %v2309_v29, %v2311_v6 }
 0x20d   : > { %2909 = vst [vmem:[%s4738_s20 + $0x28] sm:$0xff] %v2877_v41  ;;  %v2516_v20 = vadd.f32 %v2432_v40, %v2206_v2  ;;  %v1705_v2 = vsel %vm739_vm3, %v4402_v37, %v1704_v0 }
 0x20e   : > { %3277 = vmatmul.msk.f32.gmra.mxu1 %vm377_vm2, %v1700_v4  ;;  %v2729_v48 = vpop.f32.mrf.mxu0 }
 0x20f   : > { %v2810_v45 = vadd.f32 %v2726_v14, %v2516_v20  ;;  %3359 = vmatmul.msk.f32.gmra.mxu2 %vm377_vm2, %v3320_v53  ;;  %v2310_v53 = vsel %vm294_vm1, %v2308_v33, %v2309_v29  ;;  %v2604_v14 = vsel %vm739_vm3, %v2602_v10, %v2603_v58  ;;  %v3478_v29 = vld [vmem:[%s3575_s29 + $0x180] sm:$0xff] }
 0x210   : > { %3393 = vmatmul.msk.f32.gmra.mxu3 %vm377_vm2, %v2307_v7  ;;  %v3326_v7 = vld [vmem:[%s3575_s29 + $0x170] sm:$0xff]  ;;  %v1716_v54 = vrot.slane %v3478_v29, 2 }
 0x211   : > { %v2846_v50 = vadd.f32 %v4723_v47, %v2810_v45  ;;  %3427 = vmatmul.msk.f32.gmra.mxu0 %vm377_vm2, %v2601_v35  ;;  %v2314_v37 = vrot.slane %v3326_v7, 1  ;;  %v2608_v10 = vrot.slane %v3326_v7, 2 }
 0x212   : > { %v2125_v18 = vpop.f32.mrf.mxu2 }
 0x213   : > { %v2435_v55 = vpop.f32.mrf.mxu3  ;;  %v2878_v21 = vmax.f32 %v2846_v50, 0.0  ;;  %v2207_v15 = vadd.f32 %v2125_v18, %v1910_v31  ;;  %v1831_v59 = vpop.f32.mrf.mxu1  ;;  %v4844_v31 = vld [vmem:[%s3575_s29 + $0x188] sm:$0xff] }
 0x214   : > { %v1911_v56 = vadd.f32 %v1831_v59, %v4395_v16  ;;  %v3325_v16 = vld [vmem:[%s3575_s29 + $0x168] sm:$0xff]  ;;  %v1717_v50 = vrot.slane %v4844_v31, 2 }
 0x215   : > { %2910 = vst [vmem:[%s4738_s20 + $0x30] sm:$0xff] %v2878_v21  ;;  %v2517_v42 = vadd.f32 %v2435_v55, %v2207_v15  ;;  %v2313_v35 = vrot.slane %v3325_v16, 1  ;;  %v2607_v55 = vrot.slane %v3325_v16, 2 }
 0x216   : > { %3278 = vmatmul.msk.f32.gmra.mxu1 %vm377_vm2, %v4408_v38  ;;  %v2732_v32 = vpop.f32.mrf.mxu0 }
 0x217   : > { %v2811_v22 = vadd.f32 %v2729_v48, %v2517_v42  ;;  %3360 = vmatmul.msk.f32.gmra.mxu2 %vm377_vm2, %v3322_v43  ;;  %v2606_v43 = vsel %vm739_vm3, %v2603_v58, %v2605_v36  ;;  %v2609_v44 = vsel %vm739_vm3, %v2607_v55, %v2608_v10 }
 0x218   : > { %3394 = vmatmul.msk.f32.gmra.mxu3 %vm377_vm2, %v2310_v53  ;;  %v3327_v53 = vld [vmem:[%s3575_s29 + $0x178] sm:$0x3] }
 0x219   : > { %v2847_v27 = vadd.f32 %v4723_v47, %v2811_v22  ;;  %3428 = vmatmul.msk.f32.gmra.mxu0 %vm377_vm2, %v2604_v14  ;;  %v3480_v22 = vld [vmem:[%s3575_s29 + $0x160] sm:$0x3]  ;;  %v2316_v0 = vrot.slane %v3327_v53, 1 }
 0x21a   : > { %v2128_v38 = vpop.f32.mrf.mxu2  ;;  %v1709_v11 = vrot.slane %v3480_v22, 2 }
 0x21b   : > { %v2438_v9 = vpop.f32.mrf.mxu3  ;;  %v2879_v40 = vmax.f32 %v2847_v27, 0.0  ;;  %v2208_v8 = vadd.f32 %v2128_v38, %v1911_v56  ;;  %v1834_v41 = vpop.f32.mrf.mxu1  ;;  %v2610_v38 = vrot.slane %v3327_v53, 2 }
 0x21c   : > { %v1912_v45 = vadd.f32 %v1834_v41, %v4412_v51  ;;  %v2315_v51 = vsel %vm294_vm1, %v2313_v35, %v2314_v37 }
 0x21d   : > { %2911 = vst [vmem:[%s4738_s20 + $0x38] sm:$0xff] %v2879_v40  ;;  %v2518_v4 = vadd.f32 %v2438_v9, %v2208_v8  ;;  %v5117_v8 = vld [vmem:[#allocation20_spill] sm:$0xff] }
 0x21e   : > { %3279 = vmatmul.msk.f32.gmra.mxu1 %vm377_vm2, %v1705_v2  ;;  %v2735_v20 = vpop.f32.mrf.mxu0  ;;  %v1710_v41 = vsel %vm739_vm3, %v5117_v8, %v1709_v11  ;;  %v2317_v2 = vsel %vm294_vm1, %v2314_v37, %v2316_v0  ;;  %v5120_v11 = vld [vmem:[#allocation2_spill] sm:$0xff] }
 0x21f   : > { %v2812_v48 = vadd.f32 %v2732_v32, %v2518_v4  ;;  %3361 = vmatmul.msk.f32.gmra.mxu2 %vm377_vm2, %v3323_v23  ;;  %v4856_v32 = vsel %vm739_vm3, %v1716_v54, %v1717_v50  ;;  %v3328_v4 = vld [vmem:[%s3575_s29 + $0x180] sm:$0xff] }
 0x220   : > { %3395 = vmatmul.msk.f32.gmra.mxu3 %vm377_vm2, %v2312_v34 }
 0x221   : > { %v2848_v33 = vadd.f32 %v4723_v47, %v2812_v48  ;;  %3429 = vmatmul.msk.f32.gmra.mxu0 %vm377_vm2, %v2606_v43  ;;  %v2318_v48 = vrot.slane %v3328_v4, 1 }
 0x222   : > { %v2131_v18 = vpop.f32.mrf.mxu2 }
 0x223   : > { %v2441_v23 = vpop.f32.mrf.mxu3  ;;  %v2880_v58 = vmax.f32 %v2848_v33, 0.0  ;;  %v2209_v21 = vadd.f32 %v2131_v18, %v1912_v45  ;;  %v1837_v15 = vpop.f32.mrf.mxu1  ;;  %v5118_v45 = vld [vmem:[#allocation17_spill] sm:$0xff]  ;;  %v2612_v18 = vrot.slane %v3328_v4, 2 }
 0x225   : > { %2912 = vst [vmem:[%s4738_s20 + $0x40] sm:$0xff] %v2880_v58  ;;  %v2519_v59 = vadd.f32 %v2441_v23, %v2209_v21 }
 0x226   : > { %3280 = vmatmul.msk.f32.gmra.mxu1 %vm377_vm2, %v4442_v52  ;;  %v2738_v42 = vpop.f32.mrf.mxu0  ;;  %v1913_v52 = vadd.f32 %v1837_v15, %v4429_v30  ;;  %v3330_v15 = vld [vmem:[%s3575_s29 + $0x190] sm:$0x3] }
 0x227   : > { %v2813_v14 = vadd.f32 %v2735_v20, %v2519_v59  ;;  %3362 = vmatmul.msk.f32.gmra.mxu2 %vm377_vm2, %v3325_v16  ;;  %v3329_v16 = vld [vmem:[%s3575_s29 + $0x188] sm:$0xff]  ;;  %v2611_v20 = vsel %vm739_vm3, %v2608_v10, %v2610_v38  ;;  %v2321_v22 = vrot.slane %v3330_v15, 1 }
 0x228   : > { %3396 = vmatmul.msk.f32.gmra.mxu3 %vm377_vm2, %v2315_v51  ;;  %v2319_v35 = vrot.slane %v3329_v16, 1  ;;  %v2613_v23 = vrot.slane %v3329_v16, 2  ;;  %v5119_v51 = vld [vmem:[#allocation22_spill] sm:$0xff] }
 0x229   : > { %v2849_v6 = vadd.f32 %v4723_v47, %v2813_v14  ;;  %3430 = vmatmul.msk.f32.gmra.mxu0 %vm377_vm2, %v2609_v44  ;;  %v3481_v44 = vld [vmem:[%s3575_s29 + $0x178] sm:$0x3] }
 0x22a   : > { %v2134_v56 = vpop.f32.mrf.mxu2  ;;  %v2614_v53 = vsel %vm739_vm3, %v2612_v18, %v2613_v23  ;;  %v1714_v14 = vrot.slane %v3481_v44, 2  ;;  %v2322_v8 = vsel %vm294_vm1, %v2319_v35, %v2321_v22 }
 0x22b   : > { %v2444_v27 = vpop.f32.mrf.mxu3  ;;  %v2881_v9 = vmax.f32 %v2849_v6, 0.0  ;;  %v2210_v36 = vadd.f32 %v2134_v56, %v1913_v52  ;;  %v1840_v40 = vpop.f32.mrf.mxu1 }
 0x22c   : > { %v1914_v37 = vadd.f32 %v1840_v40, %v5118_v45  ;;  %v1715_v40 = vsel %vm739_vm3, %v4471_v39, %v1714_v14 }
 0x22d   : > { %2913 = vst [vmem:[%s4738_s20 + $0x48] sm:$0xff] %v2881_v9  ;;  %v2520_v34 = vadd.f32 %v2444_v27, %v2210_v36  ;;  %v2615_v27 = vrot.slane %v3330_v15, 2 }
 0x22e   : > { %3281 = vmatmul.msk.f32.gmra.mxu1 %vm377_vm2, %v1710_v41  ;;  %v2741_v30 = vpop.f32.mrf.mxu0 }
 0x22f   : > { %v2814_v43 = vadd.f32 %v2738_v42, %v2520_v34  ;;  %3363 = vmatmul.msk.f32.gmra.mxu2 %vm377_vm2, %v3326_v7  ;;  %v2320_v7 = vsel %vm294_vm1, %v2318_v48, %v2319_v35  ;;  %v3332_v34 = vld [vmem:[%s3575_s29 + $0x1a0] sm:$0xff]  ;;  %v5121_v48 = vld [vmem:[#allocation3_spill] sm:$0xff] }
 0x230   : > { %3397 = vmatmul.msk.f32.gmra.mxu3 %vm377_vm2, %v2317_v2  ;;  %v3331_v2 = vld [vmem:[%s3575_s29 + $0x198] sm:$0xff]  ;;  %v2324_v39 = vrot.slane %v3332_v34, 1 }
 0x231   : > { %v2850_v33 = vadd.f32 %v4723_v47, %v2814_v43  ;;  %3431 = vmatmul.msk.f32.gmra.mxu0 %vm377_vm2, %v2611_v20  ;;  %v2323_v43 = vrot.slane %v3331_v2, 1 }
 0x232   : > { %v2137_v29 = vpop.f32.mrf.mxu2 }
 0x233   : > { %v2447_v54 = vpop.f32.mrf.mxu3  ;;  %v2882_v55 = vmax.f32 %v2850_v33, 0.0  ;;  %v2211_v10 = vadd.f32 %v2137_v29, %v1914_v37  ;;  %v1843_v58 = vpop.f32.mrf.mxu1  ;;  %v2617_v29 = vrot.slane %v3331_v2, 2 }
 0x234   : > { %v1915_v0 = vadd.f32 %v1843_v58, %v5120_v11  ;;  %v3333_v58 = vld [vmem:[%s3575_s29 + $0x1a8] sm:$0x3] }
 0x235   : > { %2914 = vst [vmem:[%s4738_s20 + $0x50] sm:$0xff] %v2882_v55  ;;  %v2521_v21 = vadd.f32 %v2447_v54, %v2211_v10  ;;  %v2618_v54 = vrot.slane %v3332_v34, 2  ;;  %v2620_v22 = vrot.slane %v3333_v58, 2 }
 0x236   : > { %3282 = vmatmul.msk.f32.gmra.mxu1 %vm377_vm2, %v5119_v51  ;;  %v2744_v59 = vpop.f32.mrf.mxu0  ;;  %v3482_v51 = vld [vmem:[%s3575_s29 + $0x190] sm:$0x3] }
 0x237   : > { %v2815_v42 = vadd.f32 %v2741_v30, %v2521_v21  ;;  %3364 = vmatmul.msk.f32.gmra.mxu2 %vm377_vm2, %v3328_v4  ;;  %v2616_v30 = vsel %vm739_vm3, %v2613_v23, %v2615_v27  ;;  %v2619_v21 = vsel %vm739_vm3, %v2617_v29, %v2618_v54 }
 0x238   : > { %3398 = vmatmul.msk.f32.gmra.mxu3 %vm377_vm2, %v2320_v7 }
 0x239   : > { %v2851_v52 = vadd.f32 %v4723_v47, %v2815_v42  ;;  %3432 = vmatmul.msk.f32.gmra.mxu0 %vm377_vm2, %v2614_v53  ;;  %v2326_v53 = vrot.slane %v3333_v58, 1 }
 0x23a   : > { %v2140_v6 = vpop.f32.mrf.mxu2 }
 0x23b   : > { %v2450_v56 = vpop.f32.mrf.mxu3  ;;  %v2883_v38 = vmax.f32 %v2851_v52, 0.0  ;;  %v2212_v9 = vadd.f32 %v2140_v6, %v1915_v0  ;;  %v1846_v36 = vpop.f32.mrf.mxu1 }
 0x23c   : > { %v1916_v35 = vadd.f32 %v1846_v36, %v5121_v48 }
 0x23d   : > { %2915 = vst [vmem:[%s4738_s20 + $0x58] sm:$0xff] %v2883_v38  ;;  %v2522_v41 = vadd.f32 %v2450_v56, %v2212_v9  ;;  %v2327_v56 = vsel %vm294_vm1, %v2324_v39, %v2326_v53  ;;  %v2621_v38 = vsel %vm739_vm3, %v2618_v54, %v2620_v22 }
 0x23e   : > { %3283 = vmatmul.msk.f32.gmra.mxu1 %vm377_vm2, %v1715_v40  ;;  %v2747_v4 = vpop.f32.mrf.mxu0 }
 0x23f   : > { %v2816_v20 = vadd.f32 %v2744_v59, %v2522_v41  ;;  %3365 = vmatmul.msk.f32.gmra.mxu2 %vm377_vm2, %v3329_v16  ;;  %v2325_v16 = vsel %vm294_vm1, %v2323_v43, %v2324_v39  ;;  %v1719_v59 = vrot.slane %v3482_v51, 2 }
 0x240   : > { %3399 = vmatmul.msk.f32.gmra.mxu3 %vm377_vm2, %v2322_v8 }
 0x241   : > { %v2852_v45 = vadd.f32 %v4723_v47, %v2816_v20  ;;  %3433 = vmatmul.msk.f32.gmra.mxu0 %vm377_vm2, %v2616_v30  ;;  %v1720_v6 = vsel %vm739_vm3, %v1717_v50, %v1719_v59 }
 0x242   : > { %v2143_v37 = vpop.f32.mrf.mxu2 }
 0x243   : > { %v2453_v33 = vpop.f32.mrf.mxu3  ;;  %v2884_v18 = vmax.f32 %v2852_v45, 0.0  ;;  %v2213_v23 = vadd.f32 %v2143_v37, %v1916_v35  ;;  %v1849_v55 = vpop.f32.mrf.mxu1 }
 0x244   : > { %v1917_v42 = vadd.f32 %v1849_v55, %v4499_v28 }
 0x245   : > { %2916 = vst [vmem:[%s4738_s20 + $0x60] sm:$0xff] %v2884_v18  ;;  %v2523_v10 = vadd.f32 %v2453_v33, %v2213_v23 }
 0x246   : > { %3284 = vmatmul.msk.f32.gmra.mxu1 %vm377_vm2, %v4856_v32  ;;  %v2750_v7 = vpop.f32.mrf.mxu0 }
 0x247   : > { %v2817_v15 = vadd.f32 %v2747_v4, %v2523_v10  ;;  %3366 = vmatmul.msk.f32.gmra.mxu2 %vm377_vm2, %v3331_v2 }
 0x248   : > { %3400 = vmatmul.msk.f32.gmra.mxu3 %vm377_vm2, %v2325_v16 }
 0x249   : > { %v2853_v44 = vadd.f32 %v4723_v47, %v2817_v15  ;;  %3434 = vmatmul.msk.f32.gmra.mxu0 %vm377_vm2, %v2619_v21 }
 0x24a   : > { %v2146_v14 = vpop.f32.mrf.mxu2 }
 0x24b   : > { %v2456_v32 = vpop.f32.mrf.mxu3  ;;  %v2885_v11 = vmax.f32 %v2853_v44, 0.0  ;;  %v2214_v0 = vadd.f32 %v2146_v14, %v1917_v42  ;;  %v1852_v52 = vpop.f32.mrf.mxu1 }
 0x24c   : > { %v1918_v36 = vadd.f32 %v1852_v52, %v4510_v63 }
 0x24d   : > { %2917 = vst [vmem:[%s4738_s20 + $0x68] sm:$0xff] %v2885_v11  ;;  %v2524_v27 = vadd.f32 %v2456_v32, %v2214_v0 }
 0x24e   : > { %3285 = vmatmul.msk.f32.gmra.mxu1 %vm377_vm2, %v1720_v6  ;;  %v2753_v28 = vpop.f32.mrf.mxu0 }
 0x24f   : > { %v2818_v9 = vadd.f32 %v2750_v7, %v2524_v27  ;;  %3367 = vmatmul.msk.f32.gmra.mxu2 %vm377_vm2, %v3332_v34 }
 0x250   : > { %3401 = vmatmul.msk.f32.gmra.mxu3 %vm377_vm2, %v2327_v56 }
 0x251   : > { %v2854_v31 = vadd.f32 %v4723_v47, %v2818_v9  ;;  %3435 = vmatmul.msk.f32.gmra.mxu0 %vm377_vm2, %v2621_v38 }
 0x252   : > { %v2149_v50 = vpop.f32.mrf.mxu2 }
 0x253   : > { %v2459_v40 = vpop.f32.mrf.mxu3  ;;  %v2886_v8 = vmax.f32 %v2854_v31, 0.0  ;;  %v2215_v41 = vadd.f32 %v2149_v50, %v1918_v36  ;;  %v1855_v2 = vpop.f32.mrf.mxu1 }
 0x254   : > { %v1919_v34 = vadd.f32 %v1855_v2, %v4524_v57 }
 0x255   : > { %2918 = vst [vmem:[%s4738_s20 + $0x70] sm:$0xff] %v2886_v8  ;;  %v2525_v4 = vadd.f32 %v2459_v40, %v2215_v41 }
 0x256   : > { %v2756_v30 = vpop.f32.mrf.mxu0 }
 0x257   : > { %v2819_v20 = vadd.f32 %v2753_v28, %v2525_v4 }
 0x259   : > { %v2855_v43 = vadd.f32 %v4723_v47, %v2819_v20 }
 0x25a   : > { %v2152_v39 = vpop.f32.mrf.mxu2 }
 0x25b   : > { %v2462_v63 = vpop.f32.mrf.mxu3  ;;  %v2887_v48 = vmax.f32 %v2855_v43, 0.0  ;;  %v2216_v35 = vadd.f32 %v2152_v39, %v1919_v34  ;;  %v1858_v45 = vpop.f32.mrf.mxu1 }
 0x25c   : > { %v1920_v54 = vadd.f32 %v1858_v45, %v4535_v12 }
 0x25d   : > { %2919 = vst [vmem:[%s4738_s20 + $0x78] sm:$0xff] %v2887_v48  ;;  %v2526_v37 = vadd.f32 %v2462_v63, %v2216_v35 }
 0x25e   : > { %v2759_v33 = vpop.f32.mrf.mxu0 }
 0x25f   : > { %v2820_v29 = vadd.f32 %v2756_v30, %v2526_v37 }
 0x261   : > { %v2856_v18 = vadd.f32 %v4723_v47, %v2820_v29 }
 0x262   : > { %v2155_v23 = vpop.f32.mrf.mxu2 }
 0x263   : > { %v2465_v55 = vpop.f32.mrf.mxu3  ;;  %v2888_v57 = vmax.f32 %v2856_v18, 0.0  ;;  %v2217_v16 = vadd.f32 %v2155_v23, %v1920_v54  ;;  %v1861_v10 = vpop.f32.mrf.mxu1 }
 0x264   : > { %v1921_v15 = vadd.f32 %v1861_v10, %v4549_v5 }
 0x265   : > { %2920 = vst [vmem:[%s4738_s20 + $0x80] sm:$0xff] %v2888_v57  ;;  %v2527_v58 = vadd.f32 %v2465_v55, %v2217_v16 }
 0x266   : > { %v2762_v7 = vpop.f32.mrf.mxu0 }
 0x267   : > { %v2821_v21 = vadd.f32 %v2759_v33, %v2527_v58 }
 0x269   : > { %v2857_v51 = vadd.f32 %v4723_v47, %v2821_v21 }
 0x26a   : > { %v2158_v59 = vpop.f32.mrf.mxu2 }
 0x26b   : > { %v2468_v53 = vpop.f32.mrf.mxu3  ;;  %v2889_v12 = vmax.f32 %v2857_v51, 0.0  ;;  %v2218_v42 = vadd.f32 %v2158_v59, %v1921_v15  ;;  %v1864_v44 = vpop.f32.mrf.mxu1 }
 0x26c   : > { %v1922_v11 = vadd.f32 %v1864_v44, %v4560_v61 }
 0x26d   : > { %2921 = vst [vmem:[%s4738_s20 + $0x88] sm:$0xff] %v2889_v12  ;;  %v2528_v14 = vadd.f32 %v2468_v53, %v2218_v42 }
 0x26e   : > { %v2765_v32 = vpop.f32.mrf.mxu0 }
 0x26f   : > { %v2822_v22 = vadd.f32 %v2762_v7, %v2528_v14 }
 0x271   : > { %v2858_v0 = vadd.f32 %v4723_v47, %v2822_v22 }
 0x272   : > { %v2161_v52 = vpop.f32.mrf.mxu2 }
 0x273   : > { %v2471_v6 = vpop.f32.mrf.mxu3  ;;  %v2890_v5 = vmax.f32 %v2858_v0, 0.0  ;;  %v2219_v56 = vadd.f32 %v2161_v52, %v1922_v11  ;;  %v1867_v27 = vpop.f32.mrf.mxu1 }
 0x274   : > { %v1923_v36 = vadd.f32 %v1867_v27, %v4574_v1 }
 0x275   : > { %2922 = vst [vmem:[%s4738_s20 + $0x90] sm:$0xff] %v2890_v5  ;;  %v2529_v28 = vadd.f32 %v2471_v6, %v2219_v56 }
 0x276   : > { %v2768_v38 = vpop.f32.mrf.mxu0 }
 0x277   : > { %v2823_v9 = vadd.f32 %v2765_v32, %v2529_v28 }
 0x279   : > { %v2859_v31 = vadd.f32 %v4723_v47, %v2823_v9 }
 0x27a   : > { %v2164_v50 = vpop.f32.mrf.mxu2 }
 0x27b   : > { %v2474_v40 = vpop.f32.mrf.mxu3  ;;  %v2891_v61 = vmax.f32 %v2859_v31, 0.0  ;;  %v2220_v8 = vadd.f32 %v2164_v50, %v1923_v36  ;;  %v1870_v41 = vpop.f32.mrf.mxu1 }
 0x27c   : > { %v1924_v20 = vadd.f32 %v1870_v41, %v4585_v62 }
 0x27d   : > { %2923 = vst [vmem:[%s4738_s20 + $0x98] sm:$0xff] %v2891_v61  ;;  %v2530_v2 = vadd.f32 %v2474_v40, %v2220_v8 }
 0x27e   : > { %v2771_v4 = vpop.f32.mrf.mxu0 }
 0x27f   : > { %v2824_v30 = vadd.f32 %v2768_v38, %v2530_v2 }
 0x281   : > { %v2860_v34 = vadd.f32 %v4723_v47, %v2824_v30 }
 0x282   : > { %v2167_v43 = vpop.f32.mrf.mxu2 }
 0x283   : > { %v2477_v39 = vpop.f32.mrf.mxu3  ;;  %v2892_v1 = vmax.f32 %v2860_v34, 0.0  ;;  %v2221_v63 = vadd.f32 %v2167_v43, %v1924_v20  ;;  %v1873_v48 = vpop.f32.mrf.mxu1 }
 0x284   : > { %v1925_v33 = vadd.f32 %v1873_v48, %v4599_v46 }
 0x285   : > { %2924 = vst [vmem:[%s4738_s20 + $0xa0] sm:$0xff] %v2892_v1  ;;  %v2531_v35 = vadd.f32 %v2477_v39, %v2221_v63 }
 0x286   : > { %v2774_v45 = vpop.f32.mrf.mxu0 }
 0x287   : > { %v2825_v37 = vadd.f32 %v2771_v4, %v2531_v35 }
 0x289   : > { %v2861_v29 = vadd.f32 %v4723_v47, %v2825_v37 }
 0x28a   : > { %v2170_v54 = vpop.f32.mrf.mxu2 }
 0x28b   : > { %v2480_v18 = vpop.f32.mrf.mxu3  ;;  %v2893_v62 = vmax.f32 %v2861_v29, 0.0  ;;  %v2222_v23 = vadd.f32 %v2170_v54, %v1925_v33  ;;  %v1876_v55 = vpop.f32.mrf.mxu1 }
 0x28c   : > { %v1926_v58 = vadd.f32 %v1876_v55, %v4610_v49 }
 0x28d   : > { %2925 = vst [vmem:[%s4738_s20 + $0xa8] sm:$0xff] %v2893_v62  ;;  %v2532_v57 = vadd.f32 %v2480_v18, %v2222_v23 }
 0x28e   : > { %v2777_v16 = vpop.f32.mrf.mxu0 }
 0x28f   : > { %v2826_v10 = vadd.f32 %v2774_v45, %v2532_v57 }
 0x291   : > { %v2862_v7 = vadd.f32 %v4723_v47, %v2826_v10 }
 0x292   : > { %v2173_v21 = vpop.f32.mrf.mxu2 }
 0x293   : > { %v2483_v15 = vpop.f32.mrf.mxu3  ;;  %v2894_v46 = vmax.f32 %v2862_v7, 0.0  ;;  %v2223_v51 = vadd.f32 %v2173_v21, %v1926_v58  ;;  %v1879_v59 = vpop.f32.mrf.mxu1 }
 0x294   : > { %v1927_v44 = vadd.f32 %v1879_v59, %v4624_v25 }
 0x295   : > { %2926 = vst [vmem:[%s4738_s20 + $0xb0] sm:$0xff] %v2894_v46  ;;  %v2533_v53 = vadd.f32 %v2483_v15, %v2223_v51 }
 0x296   : > { %v2780_v12 = vpop.f32.mrf.mxu0 }
 0x297   : > { %v2827_v42 = vadd.f32 %v2777_v16, %v2533_v53 }
 0x299   : > { %v2863_v14 = vadd.f32 %v4723_v47, %v2827_v42 }
 0x29a   : > { %v2176_v32 = vpop.f32.mrf.mxu2 }
 0x29b   : > { %v2486_v22 = vpop.f32.mrf.mxu3  ;;  %v2895_v49 = vmax.f32 %v2863_v14, 0.0  ;;  %v2224_v11 = vadd.f32 %v2176_v32, %v1927_v44  ;;  %v1882_v0 = vpop.f32.mrf.mxu1 }
 0x29c   : > { %v1928_v56 = vadd.f32 %v1882_v0, %v4635_v24 }
 0x29d   : > { %2927 = vst [vmem:[%s4738_s20 + $0xb8] sm:$0xff] %v2895_v49  ;;  %v2534_v52 = vadd.f32 %v2486_v22, %v2224_v11 }
 0x29e   : > { %v2783_v6 = vpop.f32.mrf.mxu0 }
 0x29f   : > { %v2828_v5 = vadd.f32 %v2780_v12, %v2534_v52 }
 0x2a1   : > { %v2864_v27 = vadd.f32 %v4723_v47, %v2828_v5 }
 0x2a2   : > { %v2179_v28 = vpop.f32.mrf.mxu2 }
 0x2a3   : > { %v2489_v38 = vpop.f32.mrf.mxu3  ;;  %v2896_v25 = vmax.f32 %v2864_v27, 0.0  ;;  %v2225_v9 = vadd.f32 %v2179_v28, %v1928_v56  ;;  %v1885_v36 = vpop.f32.mrf.mxu1 }
 0x2a4   : > { %v1929_v61 = vadd.f32 %v1885_v36, %v4649_v17  ;;  %v3483_v36 = vld [vmem:[%s4990_s2] ss:$0 sm:$0xff] }
 0x2a5   : > { %2928 = vst [vmem:[%s4738_s20 + $0xc0] sm:$0xff] %v2896_v25  ;;  %v2535_v31 = vadd.f32 %v2489_v38, %v2225_v9 }
 0x2a6   : > { %v2786_v50 = vpop.f32.mrf.mxu0 }
 0x2a7   : > { %v2829_v40 = vadd.f32 %v2783_v6, %v2535_v31 }
 0x2a9   : > { %v2865_v8 = vadd.f32 %v4723_v47, %v2829_v40 }
 0x2aa   : > { %v2182_v41 = vpop.f32.mrf.mxu2 }
 0x2ab   : > { %v2492_v2 = vpop.f32.mrf.mxu3  ;;  %v2897_v24 = vmax.f32 %v2865_v8, 0.0  ;;  %v2226_v4 = vadd.f32 %v2182_v41, %v1929_v61  ;;  %v1888_v30 = vpop.f32.mrf.mxu1 }
 0x2ac   : > { %v1930_v39 = vadd.f32 %v1888_v30, %v4660_v60 }
 0x2ad   : > { %2929 = vst [vmem:[%s4738_s20 + $0xc8] sm:$0xff] %v2897_v24  ;;  %v2536_v20 = vadd.f32 %v2492_v2, %v2226_v4 }
 0x2ae   : > { %v2789_v34 = vpop.f32.mrf.mxu0 }
 0x2af   : > { %v2830_v43 = vadd.f32 %v2786_v50, %v2536_v20 }
 0x2b1   : > { %v2866_v1 = vadd.f32 %v4723_v47, %v2830_v43 }
 0x2b2   : > { %v2185_v63 = vpop.f32.mrf.mxu2 }
 0x2b3   : > { %v2495_v48 = vpop.f32.mrf.mxu3  ;;  %v2898_v17 = vmax.f32 %v2866_v1, 0.0  ;;  %v2227_v35 = vadd.f32 %v2185_v63, %v1930_v39  ;;  %v1891_v45 = vpop.f32.mrf.mxu1 }
 0x2b4   : > { %v1931_v54 = vadd.f32 %v1891_v45, %v4674_v3 }
 0x2b5   : > { %2930 = vst [vmem:[%s4738_s20 + $0xd0] sm:$0xff] %v2898_v17  ;;  %v2537_v37 = vadd.f32 %v2495_v48, %v2227_v35 }
 0x2b6   : > { %v2792_v33 = vpop.f32.mrf.mxu0 }
 0x2b7   : > { %v2831_v29 = vadd.f32 %v2789_v34, %v2537_v37 }
 0x2b9   : > { %v2867_v18 = vadd.f32 %v4723_v47, %v2831_v29 }
 0x2ba   : > { %v2188_v62 = vpop.f32.mrf.mxu2 }
 0x2bb   : > { %v2498_v23 = vpop.f32.mrf.mxu3  ;;  %v2899_v60 = vmax.f32 %v2867_v18, 0.0  ;;  %v2228_v55 = vadd.f32 %v2188_v62, %v1931_v54  ;;  %v1894_v57 = vpop.f32.mrf.mxu1 }
 0x2bc   : > { %v1932_v7 = vadd.f32 %v1894_v57, %v4685_v26 }
 0x2bd   : > { %2931 = vst [vmem:[%s4738_s20 + $0xd8] sm:$0xff] %v2899_v60  ;;  %v2538_v16 = vadd.f32 %v2498_v23, %v2228_v55 }
 0x2be   : > { %v2795_v58 = vpop.f32.mrf.mxu0 }
 0x2bf   : > { %v2832_v10 = vadd.f32 %v2792_v33, %v2538_v16 }
 0x2c1   : > { %v2868_v21 = vadd.f32 %v4723_v47, %v2832_v10 }
 0x2c2   : > { %v2191_v15 = vpop.f32.mrf.mxu2 }
 0x2c3   : > { %v2501_v46 = vpop.f32.mrf.mxu3  ;;  %v2900_v3 = vmax.f32 %v2868_v21, 0.0  ;;  %v2229_v51 = vadd.f32 %v2191_v15, %v1932_v7  ;;  %v1897_v59 = vpop.f32.mrf.mxu1 }
 0x2c4   : > { %v1933_v42 = vadd.f32 %v1897_v59, %v4699_v13 }
 0x2c5   : > { %2932 = vst [vmem:[%s4738_s20 + $0xe0] sm:$0xff] %v2900_v3  ;;  %v2539_v53 = vadd.f32 %v2501_v46, %v2229_v51 }
 0x2c6   : > { %v2798_v14 = vpop.f32.mrf.mxu0 }
 0x2c7   : > { %v2833_v12 = vadd.f32 %v2795_v58, %v2539_v53 }
 0x2c9   : > { %v2869_v44 = vadd.f32 %v4723_v47, %v2833_v12 }
 0x2ca   : > { %v2194_v32 = vpop.f32.mrf.mxu2 }
 0x2cb   : > { %v2504_v22 = vpop.f32.mrf.mxu3  ;;  %v2901_v26 = vmax.f32 %v2869_v44, 0.0  ;;  %v2230_v49 = vadd.f32 %v2194_v32, %v1933_v42  ;;  %v1900_v0 = vpop.f32.mrf.mxu1 }
 0x2cc   : > { %v1934_v6 = vadd.f32 %v1900_v0, %v4710_v19 }
 0x2cd   : > { %2933 = vst [vmem:[%s4738_s20 + $0xe8] sm:$0xff] %v2901_v26  ;;  %v2540_v11 = vadd.f32 %v2504_v22, %v2230_v49 }
 0x2ce   : > { %v2801_v38 = vpop.f32.mrf.mxu0 }
 0x2cf   : > { %v2834_v52 = vadd.f32 %v2798_v14, %v2540_v11 }
 0x2d1   : > { %v2870_v5 = vadd.f32 %v4723_v47, %v2834_v52 }
 0x2d2   : > { %v2197_v56 = vpop.f32.mrf.mxu2 }
 0x2d3   : > { %v2507_v27 = vpop.f32.mrf.mxu3  ;;  %v2902_v13 = vmax.f32 %v2870_v5, 0.0  ;;  %v2231_v28 = vadd.f32 %v2197_v56, %v1934_v6 }
 0x2d5   : > { %2934 = vst [vmem:[%s4738_s20 + $0xf0] sm:$0xff] %v2902_v13  ;;  %v2541_v25 = vadd.f32 %v2507_v27, %v2231_v28 }
 0x2d7   : > { %v2835_v9 = vadd.f32 %v2801_v38, %v2541_v25 }
 0x2d9   : > { %v2871_v31 = vadd.f32 %v3483_v36, %v2835_v9 }
 0x2db   : > { %v2903_v50 = vmax.f32 %v2871_v31, 0.0 }
 0x2dd   : > { %2935 = vst [vmem:[%s4738_s20 + $0xf8] sm:$0xff] %v2903_v50 }
 0x2de PF: > { %s13_s14 = sadd.s32 1, %s3506_s14   ;;  %s5122_s12 = smov %s3502_s13 }
 0x2df   : > { %p10_p5 = scmp.ge.s32.totalorder %s13_s14, 4   ;;  %s5123_s13 = smov %s5125_s15 }
 0x2e1   :  { %12 = sbr.rel (!%p10_p5) target bundleno = 2 (0x2), region = 73 }

</bundles_post_ra>
